<compile_context>
chip_gen: v5e
topology: v5e:2x2
jax: 0.10.0
libtpu: 0.0.40
codegen_flags: <defaults>
</compile_context>

<pallas_src>
import numpy as np
import jax
import jax.numpy as jnp
from jax.experimental import pallas as pl
from jax.experimental.pallas import tpu as pltpu

KSIZE = 7
PAD = (KSIZE - 1) // 2  # 3


def _ceil_to(v, m):
    return -(-v // m) * m


def _build_spatial_band(conv_w, bn_scale, C, H, W):
    """Dense spatial band matrices, shape (2, H*W, H*W), float32.

    band[c, flat(ii, jj), flat(io, jo)] = w[c, kh, kw] * scale_c  for
    (ii, jj) = (io + kh - PAD, jo + kw - PAD) inside the image; out-of-image
    taps are simply absent (== the conv's zero padding).  scale_0 = bn_scale
    (max plane), scale_1 = bn_scale / C (the mean plane is fed as a channel
    *sum*).  Host-side numpy; changing weights / BN stats only rebuilds this
    array -- no kernel recompile.
    """
    w = np.asarray(conv_w, np.float32).reshape(2, KSIZE, KSIZE)
    HW = H * W
    scale = (float(bn_scale), float(bn_scale) / float(C))
    band = np.zeros((2, HW, HW), np.float32)
    io, jo = np.meshgrid(np.arange(H), np.arange(W), indexing="ij")
    out_idx = (io * W + jo).ravel()
    for c in range(2):
        for kh in range(KSIZE):
            for kw in range(KSIZE):
                ii = io + kh - PAD
                jj = jo + kw - PAD
                valid = ((ii >= 0) & (ii < H) & (jj >= 0) & (jj < W)).ravel()
                in_idx = (ii * W + jj).ravel()
                band[c, in_idx[valid], out_idx[valid]] += w[c, kh, kw] * scale[c]
    return jnp.asarray(band)


def _chan_chunk(C):
    """Largest divisor of C that is <= 8 (sublane-sized reduce chunks)."""
    for d in range(min(8, C), 0, -1):
        if C % d == 0:
            return d
    return 1


def _vmem_capacity_bytes():
    try:
        cap = getattr(pltpu.get_tpu_info(), "vmem_capacity_bytes", None)
        if cap:
            return int(cap)
    except Exception:
        pass
    return 64 << 20  # conservative default: v7x per-TensorCore VMEM


def _pick_batch_block(N, C, HW, vmem_cap):
    """Images per grid step, sized against the *padded, double-buffered* VMEM
    footprint (input block, output block, band), not the raw C*H*W bytes."""
    band_bytes = 2 * _ceil_to(HW, 8) * _ceil_to(HW, 128) * 4 * 2  # x2: pipelining
    budget = max(int(vmem_cap * 0.5) - band_bytes - (4 << 20), 1 << 20)

    def blk_bytes(b):
        x_blk = b * _ceil_to(C, 8) * _ceil_to(HW, 128) * 4 * 2    # double-buffered in
        o_blk = _ceil_to(b, 8) * _ceil_to(HW, 128) * 4 * 2        # double-buffered out
        return x_blk + o_blk

    b = max(1, min(N, 256))
    while b > 1 and blk_bytes(b) > budget:
        b -= 1
    # ~64 MiB VMEM => likely v7x (2 TensorCores/chip): keep >= 2 grid steps so
    # the "parallel" batch axis can be sharded across both cores.  On 128 MiB
    # single-core chips (v5e/v6e) grow the block instead.
    if vmem_cap <= (64 << 20) and N > 1:
        b = min(b, -(-N // 2))
    return b


def _make_sbam_kernel(C, c_chunk):
    n_chunks = C // c_chunk

    def kernel(x_ref, band_ref, bias_ref, o_ref):
        # ---- ChannelPool: running max / sum over sublane-sized channel chunks
        x0 = x_ref[:, pl.ds(0, c_chunk), :].astype(jnp.float32)   # (B, cc, HW)
        cmax = jnp.max(x0, axis=1)                                # (B, HW)
        csum = jnp.sum(x0, axis=1)                                # (B, HW)

        if n_chunks > 1:
            def body(i, carry):
                m, s = carry
                start = i * c_chunk
                if c_chunk in (1, 2, 4, 8):
                    start = pl.multiple_of(start, c_chunk)
                xc = x_ref[:, pl.ds(start, c_chunk), :].astype(jnp.float32)
                return (jnp.maximum(m, jnp.max(xc, axis=1)),
                        s + jnp.sum(xc, axis=1))
            cmax, csum = jax.lax.fori_loop(1, n_chunks, body, (cmax, csum),
                                           unroll=(n_chunks <= 8))

        # ---- Conv7x7 + BN as two dense spatial-band matmuls on the MXU ------
        # (1/C and the BN scale are folded into band; flops are negligible next
        #  to the x DMA, so Precision.HIGHEST gives full f32 accuracy for free.)
        acc = jnp.dot(cmax, band_ref[0],
                      preferred_element_type=jnp.float32,
                      precision=jax.lax.Precision.HIGHEST)
        acc = acc + jnp.dot(csum, band_ref[1],
                            preferred_element_type=jnp.float32,
                            precision=jax.lax.Precision.HIGHEST)

        # ---- bias + sigmoid (EUP) and one lane-dense store ------------------
        o_ref[0] = jax.nn.sigmoid(acc + bias_ref[0]).astype(o_ref.dtype)

    return kernel


def sbam_forward(x, conv_w, bn_scale, bn_bias):
    """x: (N, C, H, W); conv_w: (1, 2, 7, 7); bn_scale / bn_bias: Python floats."""
    N, C, H, W = x.shape
    HW = H * W
    # TODO(synk): large spatial maps need a per-kh banded formulation; the
    # dense (HW, HW) band would not fit VMEM there.
    assert 2 * HW * HW * 4 <= (16 << 20), "H*W too large for dense-band SBAM kernel"

    band = _build_spatial_band(conv_w, bn_scale, C, H, W)      # (2, HW, HW) f32
    bias = jnp.full((1,), bn_bias, dtype=jnp.float32)
    x_flat = x.reshape(N, C, HW)                               # lane-dense input

    vmem_cap = _vmem_capacity_bytes()
    B_blk = _pick_batch_block(N, C, HW, vmem_cap)
    G = pl.cdiv(N, B_blk)                                      # ragged N supported
    vmem_limit = min(int(vmem_cap * 3 // 4), 100 << 20)

    cost = pl.CostEstimate(
        flops=int(N * HW * 4 * HW + 2 * N * C * HW),
        transcendentals=int(N * HW),
        bytes_accessed=int(N * C * HW * 4 + 2 * HW * HW * 4 + G * B_blk * HW * 4),
    )

    out = pl.pallas_call(
        _make_sbam_kernel(C, _chan_chunk(C)),
        out_shape=jax.ShapeDtypeStruct((G, B_blk, HW), x.dtype),
        grid_spec=pltpu.PrefetchScalarGridSpec(
            num_scalar_prefetch=0,
            grid=(G,),
            in_specs=[
                pl.BlockSpec((B_blk, C, HW), lambda n: (n, 0, 0)),
                pl.BlockSpec((2, HW, HW), lambda n: (0, 0, 0)),   # constant block
                pl.BlockSpec(memory_space=pltpu.MemorySpace.SMEM),
            ],
            out_specs=pl.BlockSpec((1, B_blk, HW), lambda n: (n, 0, 0)),
        ),
        compiler_params=pltpu.CompilerParams(
            dimension_semantics=("parallel",),
            vmem_limit_bytes=vmem_limit),
        cost_estimate=cost,
    )(x_flat, band, bias)

    # Drop the (possibly) padded tail rows and restore (N, 1, H, W).
    return out.reshape(G * B_blk, HW)[:N].reshape(N, 1, H, W)


def sbam_reference(x, conv_w, bn_scale, bn_bias):
    """Pure-JAX reference (matches the PyTorch forward with BN in eval mode)."""
    cmax = jnp.max(x, axis=1, keepdims=True)
    cmean = jnp.mean(x, axis=1, keepdims=True)
    comp = jnp.concatenate([cmax, cmean], axis=1)              # (N, 2, H, W)
    y = jax.lax.conv_general_dilated(
        comp, conv_w, window_strides=(1, 1),
        padding=[(PAD, PAD), (PAD, PAD)],
        dimension_numbers=("NCHW", "OIHW", "NCHW"),
        precision=jax.lax.Precision.HIGHEST)
    return jax.nn.sigmoid(y * bn_scale + bn_bias)


if __name__ == "__main__":
    key = jax.random.PRNGKey(0)
    k_x, k_w = jax.random.split(key)

    # Small shapes consistent with the module.
    N, C, H, W = 2, 4, 16, 16
    x = jax.random.normal(k_x, (N, C, H, W), dtype=jnp.float32)

    # Deterministic params: Conv2d(2,1,7,7,bias=False) + BatchNorm2d(1) (eval).
    conv_w = jax.random.normal(k_w, (1, 2, KSIZE, KSIZE), dtype=jnp.float32) * 0.1
    gamma, beta = 1.0, 0.0
    running_mean, running_var, eps = 0.0, 1.0, 1e-5
    bn_scale = gamma / float(np.sqrt(running_var + eps))
    bn_bias = beta - running_mean * bn_scale

    out = jax.block_until_ready(sbam_forward(x, conv_w, bn_scale, bn_bias))
    ref = sbam_reference(x, conv_w, bn_scale, bn_bias)

    assert out.shape == (N, 1, H, W)
    np.testing.assert_allclose(np.asarray(out), np.asarray(ref),
                               rtol=2e-4, atol=5e-5)
    print("KERNEL_OK")
</pallas_src>

<mosaic_0001>
module attributes {stable_mosaic.version = 11 : i64} {
  func.func @kernel(%arg0: i32, %arg1: memref<1x4x256xf32, #tpu.memory_space<vmem>>, %arg2: memref<2x256x256xf32, #tpu.memory_space<vmem>>, %arg3: memref<1xf32, #tpu.memory_space<smem>>, %arg4: memref<1x1x256xf32, #tpu.memory_space<vmem>>) attributes {dimension_semantics = [#tpu.dimension_semantics<parallel>], iteration_bounds = array<i64: 2>, scalar_prefetch = 0 : i64, scratch_operands = 0 : i64, tpu.core_type = #tpu.core_type<tc>, window_params = [{transform_indices = @transform_0, window_bounds = array<i64: 1, 4, 256>}, {pipeline_mode = #tpu.pipeline_mode<synchronous>, transform_indices = @transform_1, window_bounds = array<i64: 2, 256, 256>}, {transform_indices = @transform_2, window_bounds = array<i64: 1>}, {transform_indices = @transform_3, window_bounds = array<i64: 1, 1, 256>}]} {
    %c0 = arith.constant 0 : index
    %c0_0 = arith.constant 0 : index
    %c0_1 = arith.constant 0 : index
    %0 = vector.load %arg1[%c0, %c0_0, %c0_1] : memref<1x4x256xf32, #tpu.memory_space<vmem>>, vector<1x4x256xf32>
    %cst = arith.constant dense<0xFF800000> : vector<1x256xf32>
    %1 = vector.multi_reduction <maximumf>, %0, %cst [1] : vector<1x4x256xf32> to vector<1x256xf32>
    %cst_2 = arith.constant dense<0.000000e+00> : vector<1x256xf32>
    %2 = vector.multi_reduction <add>, %0, %cst_2 [1] : vector<1x4x256xf32> to vector<1x256xf32>
    %c0_3 = arith.constant 0 : index
    %c0_4 = arith.constant 0 : index
    %c0_5 = arith.constant 0 : index
    %3 = vector.load %arg2[%c0_3, %c0_4, %c0_5] : memref<2x256x256xf32, #tpu.memory_space<vmem>>, vector<1x256x256xf32>
    %4 = vector.shape_cast %3 : vector<1x256x256xf32> to vector<256x256xf32>
    %cst_6 = arith.constant dense<0.000000e+00> : vector<1x256xf32>
    %5 = tpu.matmul %1, %4, %cst_6 {dimension_numbers = #tpu.dot_dimension_numbers<[1], [0], [0], [1], [0, 0, 1, 1], [], []>, precision = #tpu.contract_precision<fp32>} : vector<1x256xf32>, vector<256x256xf32>, vector<1x256xf32> -> vector<1x256xf32>
    %c1 = arith.constant 1 : index
    %c0_7 = arith.constant 0 : index
    %c0_8 = arith.constant 0 : index
    %6 = vector.load %arg2[%c1, %c0_7, %c0_8] : memref<2x256x256xf32, #tpu.memory_space<vmem>>, vector<1x256x256xf32>
    %7 = vector.shape_cast %6 : vector<1x256x256xf32> to vector<256x256xf32>
    %cst_9 = arith.constant dense<0.000000e+00> : vector<1x256xf32>
    %8 = tpu.matmul %2, %7, %cst_9 {dimension_numbers = #tpu.dot_dimension_numbers<[1], [0], [0], [1], [0, 0, 1, 1], [], []>, precision = #tpu.contract_precision<fp32>} : vector<1x256xf32>, vector<256x256xf32>, vector<1x256xf32> -> vector<1x256xf32>
    %9 = arith.addf %5, %8 : vector<1x256xf32>
    %c0_10 = arith.constant 0 : index
    %10 = memref.load %arg3[%c0_10] : memref<1xf32, #tpu.memory_space<smem>>
    %11 = vector.broadcast %10 : f32 to vector<1x256xf32>
    %12 = arith.addf %9, %11 : vector<1x256xf32>
    %13 = arith.negf %12 : vector<1x256xf32>
    %14 = math.exp %13 : vector<1x256xf32>
    %cst_11 = arith.constant 1.000000e+00 : f32
    %15 = vector.broadcast %cst_11 : f32 to vector<1x256xf32>
    %16 = arith.addf %15, %14 : vector<1x256xf32>
    %17 = arith.divf %15, %16 : vector<1x256xf32>
    %c0_12 = arith.constant 0 : index
    %c0_13 = arith.constant 0 : index
    %c0_14 = arith.constant 0 : index
    %18 = vector.load %arg4[%c0_12, %c0_13, %c0_14] : memref<1x1x256xf32, #tpu.memory_space<vmem>>, vector<1x1x256xf32>
    %19 = vector.shape_cast %18 : vector<1x1x256xf32> to vector<1x256xf32>
    %20 = vector.shape_cast %17 : vector<1x256xf32> to vector<1x1x256xf32>
    tpu.vector_store %arg4[%c0_12, %c0_13, %c0_14], %20 {strides = array<i32>} : memref<1x1x256xf32, #tpu.memory_space<vmem>>, vector<1x1x256xf32>,
    return
  }
  func.func @transform_0(%arg0: i32) -> (i32, i32, i32) {
    %c0_i32 = arith.constant 0 : i32
    %c0_i32_0 = arith.constant 0 : i32
    %c0_i32_1 = arith.constant 0 : i32
    return %arg0, %c0_i32, %c0_i32_0 : i32, i32, i32
  }
  func.func @transform_1(%arg0: i32) -> (i32, i32, i32) {
    %c0_i32 = arith.constant 0 : i32
    %c0_i32_0 = arith.constant 0 : i32
    %c0_i32_1 = arith.constant 0 : i32
    %c0_i32_2 = arith.constant 0 : i32
    return %c0_i32, %c0_i32_0, %c0_i32_1 : i32, i32, i32
  }
  func.func @transform_2(%arg0: i32) -> i32 {
    %c0_i32 = arith.constant 0 : i32
    %c0_i32_0 = arith.constant 0 : i32
    return %c0_i32 : i32
  }
  func.func @transform_3(%arg0: i32) -> (i32, i32, i32) {
    %c0_i32 = arith.constant 0 : i32
    %c0_i32_0 = arith.constant 0 : i32
    %c0_i32_1 = arith.constant 0 : i32
    return %arg0, %c0_i32, %c0_i32_0 : i32, i32, i32
  }
}

</mosaic_0001>

<bundles_post_ra>
// kernel: tpu_custom_call.1
= control target key start
LH: loop header
LB: loop body
LE: loop exit
PB: predicated region body
PF: predicated region fallthrough
CT: control target
= control target key end

     0   :  { %s5669_s0 = inlined_call_operand.hbm [shape: f32[2,4,256], index: 0, kind: input, shape index: {}]   ;;  %s5670_s1 = inlined_call_operand.hbm [shape: f32[2,256,256], index: 1, kind: input, shape index: {}]   ;;  %s5671_s2 = inlined_call_operand.<no memory space> [shape: f32[1], index: 2, kind: input, shape index: {}]   ;;  %s5672_s3 = inlined_call_operand.hbm [shape: f32[2,1,256], index: 3, kind: output, shape index: {}]  }
   0x1   :  { %8 = sst [smem:[#allocation2]] %s5671_s2 }
   0x2   :  { %9 = vsyncpa [#allocation4], 0 }
   0x3   :  { %11 = vsyncpa [#allocation4 + $0x1], 0 }
   0x4   :  { %12 = vsyncpa [#allocation7], 0 }
   0x5   :  { %13 = vsyncpa [#allocation5], 0 }
   0x6   :  { %15 = vsyncpa [#allocation5 + $0x1], 0  ;;  %s3497_s14 = smov 0   ;;  %s3499_s15 = smov 0  }
   0x7   :  { %s3501_s16 = smov 0   ;;  %s3503_s17 = smov 0  }
   0x8 LB: > { %s131_s19 = sshll.u32 %s5670_s1, 4  ;;  %s3521_s20 = sadd.s32 4294967295, %s3469_s17   ;;  %s3469_s17 = sphi %s3503_s17, %s5949_s17   ;;  %s3465_s16 = sphi %s3501_s16, %s5948_s16   ;;  %s3461_s15 = sphi %s3499_s15, %s5947_s15   ;;  %s3457_s14 = sphi %s3497_s14, %s5946_s14   ;;  %s132_s19 = int_to_ptr.hbm [resolvable:$true] %s131_s19 }
   0x9   : > { %p3255_p0 = scmp.ge.s32.totalorder %s3469_s17, 1  ;;  %p42_p1 = scmp.eq.s32.totalorder %s3521_s20, 0 }
   0xa   : > { %p120_p2 = scmp.lt.s32.totalorder %s3469_s17, 3  ;;  %s3471_s22 = smov [#allocation6]  }
   0xb   : > { %s133_s23 = sshll.u32 %s3471_s22, 4  ;;  %s3472_s24 = smov 256   ;;  %s134_s23 = int_to_ptr.vmem [resolvable:$true] %s133_s23 }
   0xc   : > { %p3526_p3 = pnand %p3255_p0, %p120_p2  ;;  %s3473_s25 = smov 16  }
   0xd   : > { %s3254_s26 = sadd.s32 4294967294, %s3469_s17   ;;  %s3537_s27 = sadd.s32 1, %s3469_s17  }
   0xe   : > { %p3280_p4 = pneg %p3526_p3  ;;  %s28_s28 = sadd.s32 1, %s3465_s16 }
   0xf   : > { %s25_s29 = ssub.s32 %s3469_s17, %s3537_s27  ;;  %p35_p7 = scmp.ne.s32.totalorder %s3465_s16, %s3461_s15 }
  0x10   : > { %p3281_p6 = pnand %p3280_p4, %p42_p1  ;;  %p26_p8 = scmp.eq.s32.totalorder %s25_s29, 0 }
  0x11   : > { %p36_p9 = scmp.eq.s32.totalorder %s3469_s17, 0  ;;  %p41_p10 = scmp.ne.s32.totalorder %s3461_s15, %s3457_s14 }
  0x12   : > { %3283 = dma.hbm_to_vmem [thread:$0]  (!%p3281_p6), %s132_s19, 16384, %s134_s23, [#allocation7], %s3472_s24, %s3472_s24, %s3473_s25  }
  0x13   : > { %p107_p11 = scmp.eq.s32.totalorder %s3521_s20, 1  ;;  %p3553_p12 = por %p42_p1, %p41_p10 }
  0x14   : > { %s3549_s30 = scalar_select %p26_p8, %s3465_s16, %s28_s28  }
  0x15   : > { %p3557_p13 = por %p107_p11, %p35_p7  ;;  %p113_p0 = scmp.eq.s32.totalorder %s3254_s26, 1 }
  0x16   : > { %p37_p2 = por %p36_p9, %p35_p7  ;;  %s150_s6 = sand.u32 1, %s3465_s16  }
  0x17   : > { %p3562_p4 = por %p113_p0, %p41_p10  ;;  %p3293_p6 = scmp.lt.s32.totalorder %s3469_s17, 2 }
  0x18   : > { %s3258_s8 = sshll.u32 %s150_s6, 3  ;;  %s3271_s9 = sshll.u32 %s3469_s17, 3 }
  0x19   : > { %s159_s12 = scalar_lea.hbm %s5669_s0, %s3271_s9  ;;  %s154_s2 = scalar_lea.vmem [#allocation3], %s3258_s8 }
  0x1a   : > { %s161_s13 = sshll.u32 %s159_s12, 4  ;;  %s163_s18 = sshll.u32 %s154_s2, 4  ;;  %s162_s13 = int_to_ptr.hbm [resolvable:$true] %s161_s13  ;;  %s164_s18 = int_to_ptr.vmem [resolvable:$true] %s163_s18 }
  0x1b   : > { %p3571_p8 = pnand %p3293_p6, %p37_p2  ;;  %s151_s22 = scalar_lea.sflag [#allocation4], %s150_s6 }
  0x1c   : > { %s3369_s23 = sshra.s32 %s162_s13, 4  ;;  %s3376_s28 = scalar_lea.hbm %s5669_s0, 16  ;;  %s3370_s23 = int_to_ptr.hbm [resolvable:$true] %s3369_s23 }
  0x1d   : > { %s3371_s24 = scalar_lea.hbm %s3370_s23, 8  ;;  %p3373_p9 = pneg %p3571_p8 }
  0x1e   : > { %p3372_p7 = scmp.ne.s32.totalorder %s3370_s23, %s3371_s24  ;;  %p3377_p0 = scmp.lt.s32.totalorder %s3370_s23, %s5669_s0 }
  0x1f   : > { %p3378_p2 = scmp.lt.s32.totalorder %s3376_s28, %s3371_s24 }
  0x20   : > { %p3374_p10 = pnand %p3373_p9, %p3372_p7 }
  0x21   : > { %p3379_p6 = por %p3378_p2, %p3377_p0 }
  0x22   : > { %p3375_p11 = pneg %p3374_p10 }
  0x24   : > { %p3380_p5 = pnand %p3379_p6, %p3375_p11 }
  0x26   : > { %3383 = shalt.err (!%p3380_p5)
}
  0x27   : > { %3287 = dma.hbm_to_vmem [thread:$0]  (!%p3571_p8), %s162_s13, 128, %s164_s18, %s151_s22  }
  0x28   : > { %172 = sbr.rel (%p3526_p3) target bundleno = 634 (0x27a), region = 32 }
  0x2d   : > { %s3588_s6 = sand.u32 1, %s3461_s15  }
  0x2e   : > { %s3262_s9 = sshll.u32 %s3588_s6, 3  ;;  %s175_s10 = scalar_lea.sflag [#allocation4], %s3588_s6 }
  0x2f   : > { %s3592_s11 = scalar_lea.vmem [#allocation3], %s3262_s9 }
  0x30   : > { %3444 = dma.done.wait (%p3553_p12), %s175_s10, 128  }
  0x31   : > { %3446 = vsyncadd (%p3553_p12), %s175_s10, 4294967168 }
  0x32   : > { %3448 = dma.done.wait (%p42_p1), [#allocation7], 16384  }
  0x33   : > { %3450 = vsyncadd (%p42_p1), [#allocation7], 4294950912  ;;  %v343_v0 = vld [vmem:[#allocation6 + $0x2f0] sm:$0xff]  ;;  %v341_v1 = vld [vmem:[#allocation6 + $0x2e0] sm:$0xff]  ;;  %vm214_vm0 = vcmask 1043456   ;;  %s3105_s21 = sld [smem:[#allocation2]] }
  0x34   : > { %v339_v2 = vld [vmem:[#allocation6 + $0x2d0] sm:$0xff]  ;;  %v3602_v3 = vand.u32 4294901760, %v343_v0  ;;  %v3604_v4 = vand.u32 4294901760, %v341_v1  ;;  %v337_v6 = vld [vmem:[#allocation6 + $0x2c0] sm:$0xff]  ;;  %s3264_s4 = sshll.u32 %s3588_s6, 1  ;;  %s3268_s12 = sshll.u32 %s3521_s20, 1 }
  0x35   : > { %v3606_v5 = vand.u32 4294901760, %v339_v2  ;;  %v335_v7 = vld [vmem:[#allocation6 + $0x2b0] sm:$0xff]  ;;  %v333_v8 = vld [vmem:[#allocation6 + $0x2a0] sm:$0xff]  ;;  %v3608_v9 = vand.u32 4294901760, %v337_v6  ;;  %s3169_s18 = scalar_lea.hbm %s5672_s3, %s3268_s12  ;;  %s206_s20 = scalar_lea.vmem [#allocation8], %s3264_s4  ;;  %vm3150_vm8 = vcmask 1040384  }
  0x36   : > { %v3610_v10 = vand.u32 4294901760, %v335_v7  ;;  %v3612_v11 = vand.u32 4294901760, %v333_v8  ;;  %v331_v12 = vld [vmem:[#allocation6 + $0x290] sm:$0xff]  ;;  %v329_v13 = vld [vmem:[#allocation6 + $0x280] sm:$0xff]  ;;  %378 = vmatpush.msra.mxu0 %v3602_v3  ;;  %v3616_v14 = vsub.f32 %v343_v0, %v3602_v3  ;;  %v3619_v15 = vsub.f32 %v341_v1, %v3604_v4  ;;  %574 = vmatpush.msra.mxu3 %v3602_v3  ;;  %s3171_s19 = sshll.u32 %s206_s20, 4  ;;  %s3173_s22 = sshll.u32 %s3169_s18, 4  ;;  %s3172_s19 = int_to_ptr.vmem [resolvable:$true] %s3171_s19  ;;  %s3174_s22 = int_to_ptr.hbm [resolvable:$true] %s3173_s22 }
  0x37   : > { %v3623_v16 = vsub.f32 %v339_v2, %v3606_v5  ;;  %v3625_v17 = vand.u32 4294901760, %v331_v12  ;;  %v327_v18 = vld [vmem:[#allocation6 + $0x270] sm:$0xff]  ;;  %v3628_v19 = vsub.f32 %v337_v6, %v3608_v9  ;;  %v3641_v25 = vand.u32 4294901760, %v329_v13  ;;  %v325_v26 = vld [vmem:[#allocation6 + $0x260] sm:$0xff]  ;;  %s3159_s23 = scalar_lea.sflag [#allocation5], %s3588_s6  ;;  %s3413_s24 = sshra.s32 %s3174_s22, 4  ;;  %s3414_s24 = int_to_ptr.hbm [resolvable:$true] %s3413_s24 }
  0x38   : > { %v3631_v20 = vsub.f32 %v335_v7, %v3610_v10  ;;  %v3634_v21 = vsub.f32 %v333_v8, %v3612_v11  ;;  %380 = vmatpush.msra.mxu0 %v3604_v4  ;;  %521 = vmatpush.msra.mxu2 %v3616_v14  ;;  %v5688_v22 = vand.u32 4294901760, %v3616_v14  ;;  %v5685_v23 = vand.u32 4294901760, %v3619_v15  ;;  %v207_v34 = vld [vmem:[%s3592_s11] sm:$0xff]  ;;  %v321_v43 = vld [vmem:[#allocation6 + $0x240] sm:$0xff]  ;;  %s3415_s25 = scalar_lea.hbm %s3414_s24, 2  ;;  %s3419_s29 = scalar_lea.hbm %s5672_s3, 4 }
  0x39   : > { %v5684_v24 = vand.u32 4294901760, %v3623_v16  ;;  %576 = vmatpush.msra.mxu3 %v3604_v4  ;;  %v5682_v27 = vand.u32 4294901760, %v3628_v19  ;;  %v3645_v28 = vand.u32 4294901760, %v327_v18  ;;  %v3648_v29 = vsub.f32 %v331_v12, %v3625_v17  ;;  %v323_v37 = vld [vmem:[#allocation6 + $0x250] sm:$0xff]  ;;  %209 = vst [vmem:[#allocation1] ss:$2 sm:$0xff] %v207_v34  ;;  %p3416_p1 = scmp.ne.s32.totalorder %s3414_s24, %s3415_s25  ;;  %p3420_p12 = scmp.lt.s32.totalorder %s3414_s24, %s5672_s3 }
  0x3a   : > { %382 = vmatpush.msra.mxu0 %v3606_v5  ;;  %524 = vmatpush.msra.mxu2 %v3619_v15  ;;  %v421_v30 = vsub.f32 %v3616_v14, %v5688_v22  ;;  %v427_v31 = vsub.f32 %v3619_v15, %v5685_v23  ;;  %v5681_v33 = vand.u32 4294901760, %v3631_v20  ;;  %v3664_v35 = vand.u32 4294901760, %v325_v26  ;;  %v319_v49 = vld [vmem:[#allocation6 + $0x230] sm:$0xff]  ;;  %v317_v55 = vld [vmem:[#allocation6 + $0x220] sm:$0xff]  ;;  %p3421_p8 = scmp.lt.s32.totalorder %s3419_s29, %s3415_s25 }
  0x3b   : > { %v433_v32 = vsub.f32 %v3623_v16, %v5684_v24  ;;  %578 = vmatpush.msra.mxu3 %v3606_v5  ;;  %v5680_v36 = vand.u32 4294901760, %v3634_v21  ;;  %v439_v40 = vsub.f32 %v3628_v19, %v5682_v27  ;;  %v3673_v41 = vsub.f32 %v329_v13, %v3641_v25  ;;  %v375_v56 = vld [vmem:[#allocation6 + $0x3f0] sm:$0xff]  ;;  %v313_v8 = vld [vmem:[#allocation6 + $0x200] sm:$0xff]  ;;  %p3417_p3 = pnand %p3416_p1, %p3557_p13 }
  0x3c   : > { %384 = vmatpush.msra.mxu0 %v3608_v9  ;;  %v422_v38 = vand.u32 4294901760, %v421_v30  ;;  %527 = vmatpush.msra.mxu2 %v3623_v16  ;;  %v428_v39 = vand.u32 4294901760, %v427_v31  ;;  %v5678_v42 = vand.u32 4294901760, %v3648_v29  ;;  %v445_v45 = vsub.f32 %v3631_v20, %v5681_v33  ;;  %v315_v63 = vld [vmem:[#allocation6 + $0x210] sm:$0xff]  ;;  %v373_v12 = vld [vmem:[#allocation6 + $0x3e0] sm:$0xff]  ;;  %p3422_p7 = por %p3421_p8, %p3420_p12 }
  0x3d   : > { %580 = vmatpush.msra.mxu3 %v3608_v9  ;;  %v434_v44 = vand.u32 4294901760, %v433_v32  ;;  %v3681_v46 = vand.u32 4294901760, %v323_v37  ;;  %v3684_v47 = vsub.f32 %v327_v18, %v3645_v28  ;;  %v451_v48 = vsub.f32 %v3634_v21, %v5680_v36  ;;  %v361_v33 = vld [vmem:[#allocation6 + $0x380] sm:$0xff]  ;;  %v359_v23 = vld [vmem:[#allocation6 + $0x370] sm:$0xff]  ;;  %p3418_p5 = pneg %p3417_p3 }
  0x3e   : > { %386 = vmatpush.msra.mxu0 %v3610_v10  ;;  %423 = vmatpush.msra.mxu1 %v422_v38  ;;  %v440_v50 = vand.u32 4294901760, %v439_v40  ;;  %v3692_v51 = vand.u32 4294901760, %v321_v43  ;;  %v5677_v52 = vand.u32 4294901760, %v3673_v41  ;;  %v3696_v53 = vsub.f32 %v325_v26, %v3664_v35  ;;  %v357_v22 = vld [vmem:[#allocation6 + $0x360] sm:$0xff] }
  0x3f   : > { %530 = vmatpush.msra.mxu2 %v3628_v19  ;;  %582 = vmatpush.msra.mxu3 %v3610_v10  ;;  %v457_v54 = vsub.f32 %v3648_v29, %v5678_v42  ;;  %v446_v57 = vand.u32 4294901760, %v445_v45  ;;  %v3704_v58 = vand.u32 4294901760, %v319_v49  ;;  %v5676_v59 = vand.u32 4294901760, %v3684_v47  ;;  %p3423_p9 = pnand %p3422_p7, %p3418_p5 }
  0x40   : > { %388 = vmatpush.msra.mxu0 %v3612_v11  ;;  %429 = vmatpush.msra.mxu1 %v428_v39  ;;  %v3708_v60 = vsub.f32 %v323_v37, %v3681_v46  ;;  %v3710_v61 = vld.sshfl [vmem:[#allocation1] sm:$0xff pattern:$0x75316420]  ;;  %v452_v62 = vand.u32 4294901760, %v451_v48  ;;  %v463_v1 = vsub.f32 %v3673_v41, %v5677_v52  ;;  %v3720_v2 = vand.u32 4294901760, %v317_v55  ;;  %v363_v52 = vld [vmem:[#allocation6 + $0x390] sm:$0xff] }
  0x41   : > { %533 = vmatpush.msra.mxu2 %v3631_v20  ;;  %584 = vmatpush.msra.mxu3 %v3612_v11  ;;  %5775 = vst [vmem:[#allocation12_spill] sm:$0xff] %v3710_v61  ;;  %v3714_v0 = vld.sshfl [vmem:[#allocation1 + $0x8] sm:$0xff pattern:$0x75316420]  ;;  %v5674_v6 = vand.u32 4294901760, %v3696_v53  ;;  %v3724_v7 = vsub.f32 %v321_v43, %v3692_v51  ;;  %v458_v13 = vand.u32 4294901760, %v457_v54  ;;  %v469_v26 = vsub.f32 %v3684_v47, %v5676_v59 }
  0x42   : > { %390 = vmatpush.msra.mxu0 %v3625_v17  ;;  %435 = vmatpush.msra.mxu1 %v434_v44  ;;  %5776 = vst [vmem:[#allocation13_spill] sm:$0xff] %v3714_v0  ;;  %v3728_v18 = vand.u32 4294901760, %v375_v56  ;;  %v3734_v30 = vand.u32 4294901760, %v315_v63  ;;  %v5673_v31 = vand.u32 4294901760, %v3708_v60  ;;  %v3738_v32 = vsub.f32 %v319_v49, %v3704_v58  ;;  %v369_v49 = vld [vmem:[#allocation6 + $0x3c0] sm:$0xff] }
  0x43   : > { %536 = vmatpush.msra.mxu2 %v3634_v21  ;;  %586 = vmatpush.msra.mxu3 %v3625_v17  ;;  %5777 = vst [vmem:[#allocation14_spill] sm:$0xff] %v3720_v2  ;;  %v3742_v37 = vand.u32 4294901760, %v313_v8  ;;  %v3744_v38 = vand.u32 4294901760, %v373_v12  ;;  %v464_v39 = vand.u32 4294901760, %v463_v1  ;;  %v475_v40 = vsub.f32 %v3696_v53, %v5674_v6  ;;  %v367_v1 = vld [vmem:[#allocation6 + $0x3b0] sm:$0xff]  ;;  %v365_v6 = vld [vmem:[#allocation6 + $0x3a0] sm:$0xff] }
  0x44   : > { %392 = vmatpush.msra.mxu0 %v3641_v25  ;;  %441 = vmatpush.msra.mxu1 %v440_v50  ;;  %229 = vst [vmem:[#allocation1] ss:$2 sm:$0xff] %v207_v34  ;;  %v371_v34 = vld [vmem:[#allocation6 + $0x3d0] sm:$0xff]  ;;  %v5675_v43 = vand.u32 4294901760, %v3724_v7  ;;  %v3752_v44 = vsub.f32 %v317_v55, %v3720_v2  ;;  %v3757_v45 = vsub.f32 %v375_v56, %v3728_v18  ;;  %v470_v50 = vand.u32 4294901760, %v469_v26 }
  0x45   : > { %539 = vmatpush.msra.mxu2 %v3648_v29  ;;  %588 = vmatpush.msra.mxu3 %v3641_v25  ;;  %5778 = vst [vmem:[#allocation15_spill] sm:$0xff] %v3728_v18  ;;  %v3759_v48 = vand.u32 4294901760, %v371_v34  ;;  %v481_v54 = vsub.f32 %v3708_v60, %v5673_v31  ;;  %v5679_v55 = vand.u32 4294901760, %v3738_v32  ;;  %v3772_v56 = vsub.f32 %v313_v8, %v3742_v37 }
  0x46   : > { %394 = vmatpush.msra.mxu0 %v3645_v28  ;;  %447 = vmatpush.msra.mxu1 %v446_v57  ;;  %5779 = vst [vmem:[#allocation16_spill] sm:$0xff] %v3734_v30  ;;  %v3767_v57 = vsub.f32 %v315_v63, %v3734_v30  ;;  %v487_v63 = vsub.f32 %v3724_v7, %v5675_v43  ;;  %v5683_v26 = vand.u32 4294901760, %v3752_v44  ;;  %v3782_v31 = vand.u32 4294901760, %v369_v49 }
  0x47   : > { %542 = vmatpush.msra.mxu2 %v3673_v41  ;;  %590 = vmatpush.msra.mxu3 %v3645_v28  ;;  %5780 = vst [vmem:[#allocation17_spill] sm:$0xff] %v3742_v37  ;;  %v5686_v8 = vand.u32 4294901760, %v3757_v45  ;;  %v3795_v59 = vand.u32 4294901760, %v367_v1  ;;  %v3808_v36 = vand.u32 4294901760, %v365_v6  ;;  %v5782_v61 = vand.u32 4294901760, %v3616_v14  ;;  %v355_v14 = vld [vmem:[#allocation6 + $0x350] sm:$0xff] }
  0x48   : > { %396 = vmatpush.msra.mxu0 %v3664_v35  ;;  %453 = vmatpush.msra.mxu1 %v452_v62  ;;  %v3775_v62 = vsub.f32 %v373_v12, %v3744_v38  ;;  %v3788_v12 = vsub.f32 %v371_v34, %v3759_v48  ;;  %v5687_v43 = vand.u32 4294901760, %v3767_v57  ;;  %v5691_v34 = vand.u32 4294901760, %v3772_v56 }
  0x49   : > { %545 = vmatpush.msra.mxu2 %v3684_v47  ;;  %592 = vmatpush.msra.mxu3 %v3664_v35  ;;  %v762_v27 = vsub.f32 %v3757_v45, %v5686_v8  ;;  %v3823_v24 = vsub.f32 %v367_v1, %v3795_v59 }
  0x4a   : > { %398 = vmatpush.msra.mxu0 %v3681_v46  ;;  %459 = vmatpush.msra.mxu1 %v458_v13  ;;  %v476_v13 = vand.u32 4294901760, %v475_v40  ;;  %5781 = vst [vmem:[#allocation18_spill] sm:$0xff] %v3788_v12  ;;  %v493_v40 = vsub.f32 %v3738_v32, %v5679_v55  ;;  %v5689_v42 = vand.u32 4294901760, %v3775_v62  ;;  %v3806_v55 = vsub.f32 %v369_v49, %v3782_v31 }
  0x4b   : > { %548 = vmatpush.msra.mxu2 %v3696_v53  ;;  %594 = vmatpush.msra.mxu3 %v3681_v46  ;;  %v511_v1 = vsub.f32 %v3772_v56, %v5691_v34  ;;  %v230_v0 = vld.sshfl [vmem:[#allocation1] sm:$0xff pattern:$0x75316420]  ;;  %v3849_v34 = vand.u32 4294901760, %v359_v23 }
  0x4c   : > { %400 = vmatpush.msra.mxu0 %v3692_v51  ;;  %465 = vmatpush.msra.mxu1 %v464_v39  ;;  %v482_v39 = vand.u32 4294901760, %v481_v54  ;;  %v499_v54 = vsub.f32 %v3752_v44, %v5683_v26  ;;  %v494_v49 = vand.u32 4294901760, %v493_v40  ;;  %v505_v26 = vsub.f32 %v3767_v57, %v5687_v43 }
  0x4d   : > { %551 = vmatpush.msra.mxu2 %v3708_v60  ;;  %596 = vmatpush.msra.mxu3 %v3692_v51  ;;  %v768_v8 = vsub.f32 %v3775_v62, %v5689_v42  ;;  %v3838_v43 = vsub.f32 %v365_v6, %v3808_v36  ;;  %v763_v42 = vand.u32 4294901760, %v762_v27  ;;  %v512_v40 = vand.u32 4294901760, %v511_v1 }
  0x4e   : > { %402 = vmatpush.msra.mxu0 %v3704_v58  ;;  %471 = vmatpush.msra.mxu1 %v470_v50  ;;  %v488_v50 = vand.u32 4294901760, %v487_v63  ;;  %v3816_v63 = vand.u32 4294901760, %v363_v52  ;;  %v506_v6 = vand.u32 4294901760, %v505_v26  ;;  %v231_v26 = vld.sshfl [vmem:[#allocation1 + $0x8] sm:$0xff pattern:$0x75316420] }
  0x4f   : > { %554 = vmatpush.msra.mxu2 %v3724_v7  ;;  %598 = vmatpush.msra.mxu3 %v3704_v58  ;;  %v769_v27 = vand.u32 4294901760, %v768_v8  ;;  %v5786_v8 = vand.u32 4294901760, %v3623_v16  ;;  %v5787_v1 = vand.u32 4294901760, %v3823_v24  ;;  %v241_v16 = vsel %vm214_vm0, %v231_v26, 0.0 }
  0x50   : > { %404 = vmatpush.msra.mxu0 %v3720_v2  ;;  %477 = vmatpush.msra.mxu1 %v476_v13  ;;  %v3830_v13 = vand.u32 4294901760, %v361_v33 }
  0x51   : > { %557 = vmatpush.msra.mxu2 %v3738_v32  ;;  %600 = vmatpush.msra.mxu3 %v3720_v2  ;;  %v5789_v2 = vand.u32 4294901760, %v3838_v43 }
  0x52   : > { %406 = vmatpush.msra.mxu0 %v3734_v30  ;;  %483 = vmatpush.msra.mxu1 %v482_v39  ;;  %v500_v39 = vand.u32 4294901760, %v499_v54 }
  0x53   : > { %560 = vmatpush.msra.mxu2 %v3752_v44  ;;  %602 = vmatpush.msra.mxu3 %v3734_v30  ;;  %v3847_v30 = vsub.f32 %v363_v52, %v3816_v63  ;;  %v3859_v52 = vand.u32 4294901760, %v357_v22 }
  0x54   : > { %408 = vmatpush.msra.mxu0 %v3742_v37  ;;  %489 = vmatpush.msra.mxu1 %v488_v50  ;;  %v5783_v50 = vand.u32 4294901760, %v3788_v12 }
  0x55   : > { %563 = vmatpush.msra.mxu2 %v3767_v57  ;;  %604 = vmatpush.msra.mxu3 %v3742_v37  ;;  %v5785_v37 = vand.u32 4294901760, %v3806_v55 }
  0x56   : > { %615 = vmatpush.msrb.mxu0 %v5782_v61  ;;  %v774_v54 = vsub.f32 %v3788_v12, %v5783_v50  ;;  %495 = vmatpush.msra.mxu1 %v494_v49  ;;  %v5784_v61 = vand.u32 4294901760, %v3619_v15  ;;  %v3857_v50 = vsub.f32 %v361_v33, %v3830_v13  ;;  %v234_v49 = vsel %vm214_vm0, %v230_v0, 0.0 }
  0x57   : > { %566 = vmatpush.msra.mxu2 %v3772_v56  ;;  %v780_v15 = vsub.f32 %v3806_v55, %v5785_v37  ;;  %v235_v12 = vrot.slane %v234_v49, 4  ;;  %764 = vmatpush.msrb.mxu3 %v763_v42  ;;  %v3871_v0 = vsub.f32 %v359_v23, %v3849_v34  ;;  %v786_v37 = vsub.f32 %v3823_v24, %v5787_v1 }
  0x58   : > { %619 = vmatpush.msrb.mxu0 %v5784_v61  ;;  %501 = vmatpush.msra.mxu1 %v500_v39  ;;  %v775_v33 = vand.u32 4294901760, %v774_v54  ;;  %v353_v39 = vld [vmem:[#allocation6 + $0x340] sm:$0xff]  ;;  %v3877_v61 = vand.u32 4294901760, %v355_v14  ;;  %v5788_v42 = vand.u32 4294901760, %v3628_v19  ;;  %v3884_v54 = vsub.f32 %v357_v22, %v3859_v52 }
  0x59   : > { %719 = vmatpush.msrb.mxu2 %v3728_v18  ;;  %v236_v18 = vadd.f32 %v235_v12, %v234_v49  ;;  %770 = vmatpush.msrb.mxu3 %v769_v27  ;;  %v781_v1 = vand.u32 4294901760, %v780_v15  ;;  %v792_v12 = vsub.f32 %v3838_v43, %v5789_v2  ;;  %v3890_v49 = vand.u32 4294901760, %v353_v39 }
  0x5a   : > { %623 = vmatpush.msrb.mxu0 %v5786_v8  ;;  %507 = vmatpush.msra.mxu1 %v506_v6  ;;  %v351_v6 = vld [vmem:[#allocation6 + $0x330] sm:$0xff]  ;;  %v242_v8 = vrot.slane %v241_v16, 4  ;;  %v5790_v27 = vand.u32 4294901760, %v3631_v20  ;;  %v5791_v22 = vand.u32 4294901760, %v3847_v30  ;;  %v787_v15 = vand.u32 4294901760, %v786_v37 }
  0x5b   : > { %721 = vmatpush.msrb.mxu2 %v3744_v38  ;;  %v237_v19 = vrot.slane %v236_v18, 2  ;;  %776 = vmatpush.msrb.mxu3 %v775_v33  ;;  %v3901_v2 = vsub.f32 %v355_v14, %v3877_v61  ;;  %v3903_v23 = vand.u32 4294901760, %v351_v6  ;;  %v793_v14 = vand.u32 4294901760, %v792_v12 }
  0x5c   : > { %627 = vmatpush.msrb.mxu0 %v5788_v42  ;;  %513 = vmatpush.msra.mxu1 %v512_v40  ;;  %v798_v26 = vsub.f32 %v3847_v30, %v5791_v22  ;;  %v809_v40 = vand.u32 4294901760, %v3871_v0  ;;  %v243_v42 = vadd.f32 %v242_v8, %v241_v16  ;;  %v815_v16 = vand.u32 4294901760, %v3884_v54  ;;  %v349_v8 = vld [vmem:[#allocation6 + $0x320] sm:$0xff] }
  0x5d   : > { %723 = vmatpush.msrb.mxu2 %v3759_v48  ;;  %v238_v20 = vadd.f32 %v237_v19, %v236_v18  ;;  %782 = vmatpush.msrb.mxu3 %v781_v1  ;;  %v3914_v37 = vsub.f32 %v353_v39, %v3890_v49  ;;  %v821_v1 = vand.u32 4294901760, %v3901_v2  ;;  %v3924_v39 = vand.u32 4294901760, %v349_v8 }
  0x5e   : > { %631 = vmatpush.msrb.mxu0 %v5790_v27  ;;  %682 = vmatpush.msrb.mxu1 %v3602_v3  ;;  %v5792_v27 = vand.u32 4294901760, %v3634_v21  ;;  %v5793_v3 = vand.u32 4294901760, %v3857_v50  ;;  %v244_v33 = vrot.slane %v243_v42, 2  ;;  %v5794_v21 = vand.u32 4294901760, %v3648_v29 }
  0x5f   : > { %725 = vmatpush.msrb.mxu2 %v3782_v31  ;;  %v239_v18 = vrot.slane %v238_v20, 1  ;;  %v810_v19 = vsub.f32 %v3871_v0, %v809_v40  ;;  %788 = vmatpush.msrb.mxu3 %v787_v15  ;;  %v3927_v12 = vsub.f32 %v351_v6, %v3903_v23  ;;  %v827_v15 = vand.u32 4294901760, %v3914_v37 }
  0x60   : > { %635 = vmatpush.msrb.mxu0 %v5792_v27  ;;  %684 = vmatpush.msrb.mxu1 %v3604_v4  ;;  %v804_v22 = vsub.f32 %v3857_v50, %v5793_v3  ;;  %v799_v4 = vand.u32 4294901760, %v798_v26  ;;  %v347_v27 = vld [vmem:[#allocation6 + $0x310] sm:$0xff]  ;;  %v245_v3 = vadd.f32 %v244_v33, %v243_v42  ;;  %v816_v42 = vsub.f32 %v3884_v54, %v815_v16 }
  0x61   : > { %727 = vmatpush.msrb.mxu2 %v3795_v59  ;;  %v240_v29 = vadd.f32 %v239_v18, %v238_v20  ;;  %794 = vmatpush.msrb.mxu3 %v793_v14  ;;  %v3939_v6 = vand.u32 4294901760, %v347_v27  ;;  %v345_v20 = vld [vmem:[#allocation6 + $0x300] sm:$0xff]  ;;  %v833_v14 = vand.u32 4294901760, %v3927_v12 }
  0x62   : > { %639 = vmatpush.msrb.mxu0 %v5794_v21  ;;  %686 = vmatpush.msrb.mxu1 %v3606_v5  ;;  %v5795_v5 = vand.u32 4294901760, %v3673_v41  ;;  %v805_v26 = vand.u32 4294901760, %v804_v22  ;;  %v246_v18 = vrot.slane %v245_v3, 1  ;;  %v5797_v41 = vand.u32 4294901760, %v3684_v47 }
  0x63   : > { %729 = vmatpush.msrb.mxu2 %v3808_v36  ;;  %v3937_v33 = vand.u32 4294901760, %v240_v29  ;;  %800 = vmatpush.msrb.mxu3 %v799_v4  ;;  %v822_v22 = vsub.f32 %v3901_v2, %v821_v1  ;;  %v5798_v47 = vand.u32 4294901760, %v3696_v53  ;;  %v828_v4 = vsub.f32 %v3914_v37, %v827_v15 }
  0x64   : > { %643 = vmatpush.msrb.mxu0 %v5795_v5  ;;  %688 = vmatpush.msrb.mxu1 %v3608_v9  ;;  %v811_v9 = vand.u32 4294901760, %v810_v19  ;;  %v3953_v5 = vsub.f32 %v349_v8, %v3924_v39  ;;  %v3958_v19 = vand.u32 4294901760, %v345_v20  ;;  %v3968_v8 = vsub.f32 %v347_v27, %v3939_v6 }
  0x65   : > { %731 = vmatpush.msrb.mxu2 %v3816_v63  ;;  %5796 = vst [vmem:[#allocation19_spill] sm:$0xff] %v3937_v33  ;;  %v3950_v21 = vsub.f32 %v240_v29, %v3937_v33  ;;  %806 = vmatpush.msrb.mxu3 %v805_v26  ;;  %v247_v53 = vadd.f32 %v246_v18, %v245_v3 }
  0x66   : > { %647 = vmatpush.msrb.mxu0 %v5797_v41  ;;  %690 = vmatpush.msrb.mxu1 %v3610_v10  ;;  %v817_v10 = vand.u32 4294901760, %v816_v42  ;;  %v5800_v41 = vand.u32 4294901760, %v3708_v60  ;;  %v834_v26 = vsub.f32 %v3927_v12, %v833_v14  ;;  %v839_v42 = vand.u32 4294901760, %v3953_v5 }
  0x67   : > { %733 = vmatpush.msrb.mxu2 %v3830_v13  ;;  %v3965_v29 = vand.u32 4294901760, %v3950_v21  ;;  %812 = vmatpush.msrb.mxu3 %v811_v9  ;;  %v3982_v60 = vsub.f32 %v345_v20, %v3958_v19  ;;  %v845_v3 = vand.u32 4294901760, %v3968_v8  ;;  %v3988_v18 = vand.u32 4294901760, %v247_v53 }
  0x68   : > { %651 = vmatpush.msrb.mxu0 %v5798_v47  ;;  %692 = vmatpush.msrb.mxu1 %v3612_v11  ;;  %v823_v11 = vand.u32 4294901760, %v822_v22  ;;  %v5801_v47 = vand.u32 4294901760, %v3724_v7  ;;  %v5803_v9 = vand.u32 4294901760, %v3738_v32  ;;  %v840_v7 = vsub.f32 %v3953_v5, %v839_v42 }
  0x69   : > { %735 = vmatpush.msrb.mxu2 %v3849_v34  ;;  %5799 = vst [vmem:[#allocation20_spill] sm:$0xff] %v3965_v29  ;;  %818 = vmatpush.msrb.mxu3 %v817_v10  ;;  %v412_v27 = vsub.f32 %v3950_v21, %v3965_v29  ;;  %v5804_v20 = vand.u32 4294901760, %v3752_v44  ;;  %v851_v22 = vand.u32 4294901760, %v3982_v60  ;;  %v4008_v10 = vsub.f32 %v247_v53, %v3988_v18 }
  0x6a   : > { %655 = vmatpush.msrb.mxu0 %v5800_v41  ;;  %694 = vmatpush.msrb.mxu1 %v3625_v17  ;;  %v829_v17 = vand.u32 4294901760, %v828_v4  ;;  %5802 = vst [vmem:[#allocation21_spill] sm:$0xff] %v3988_v18  ;;  %v5806_v4 = vand.u32 4294901760, %v3767_v57  ;;  %v5807_v44 = vand.u32 4294901760, %v3772_v56 }
  0x6b   : > { %737 = vmatpush.msrb.mxu2 %v3859_v52  ;;  %824 = vmatpush.msrb.mxu3 %v823_v11  ;;  %v4002_v32 = vand.u32 4294901760, %v412_v27  ;;  %5805 = vst [vmem:[#allocation22_spill] sm:$0xff] %v4008_v10  ;;  %v852_v41 = vsub.f32 %v3982_v60, %v851_v22  ;;  %v5810_v11 = vld [vmem:[#allocation18_spill] sm:$0xff]  ;;  %v5815_v27 = vld [vmem:[#allocation15_spill] sm:$0xff] }
  0x6c   : > { %659 = vmatpush.msrb.mxu0 %v5801_v47  ;;  %696 = vmatpush.msrb.mxu1 %v3641_v25  ;;  %v835_v25 = vand.u32 4294901760, %v834_v26  ;;  %v5812_v26 = vld [vmem:[#allocation16_spill] sm:$0xff]  ;;  %v5813_v47 = vand.u32 4294901760, %v3775_v62 }
  0x6d   : > { %739 = vmatpush.msrb.mxu2 %v3877_v61  ;;  %830 = vmatpush.msrb.mxu3 %v829_v17  ;;  %v853_v56 = vand.u32 4294901760, %v852_v41 }
  0x6e   : > { %663 = vmatpush.msrb.mxu0 %v5803_v9  ;;  %698 = vmatpush.msrb.mxu1 %v3645_v28  ;;  %v846_v28 = vsub.f32 %v3968_v8, %v845_v3  ;;  %v5816_v9 = vld [vmem:[#allocation17_spill] sm:$0xff] }
  0x6f   : > { %741 = vmatpush.msrb.mxu2 %v3890_v49  ;;  %836 = vmatpush.msrb.mxu3 %v835_v25  ;;  %v5819_v25 = vand.u32 4294901760, %v3823_v24 }
  0x70   : > { %667 = vmatpush.msrb.mxu0 %v5804_v20  ;;  %700 = vmatpush.msrb.mxu1 %v3664_v35  ;;  %v841_v35 = vand.u32 4294901760, %v840_v7  ;;  %v847_v57 = vand.u32 4294901760, %v846_v28 }
  0x71   : > { %743 = vmatpush.msrb.mxu2 %v3903_v23  ;;  %414 = vmatmul.f32.vlgmr.msra.gmra.mxu0 %v4002_v32 }
  0x72   : > { %671 = vmatpush.msrb.mxu0 %v5806_v4  ;;  %702 = vmatpush.msrb.mxu1 %v3681_v46  ;;  %v4023_v46 = vand.u32 4294901760, %v4008_v10 }
  0x73   : > { %745 = vmatpush.msrb.mxu2 %v3924_v39  ;;  %842 = vmatpush.msrb.mxu3 %v841_v35  ;;  %v324_v35 = vld [vmem:[#allocation6 + $0x258] sm:$0xff] }
  0x74   : > { %675 = vmatpush.msrb.mxu0 %v5807_v44  ;;  %704 = vmatpush.msrb.mxu1 %v3692_v51  ;;  %5808 = vst [vmem:[#allocation23_spill] sm:$0xff] %v4023_v46  ;;  %v5809_v51 = vld [vmem:[#allocation14_spill] sm:$0xff]  ;;  %v753_v53 = vsub.f32 %v4008_v10, %v4023_v46 }
  0x75   : > { %747 = vmatpush.msrb.mxu2 %v3939_v6  ;;  %848 = vmatpush.msrb.mxu3 %v847_v57 }
  0x76   : > { %862 = vmatpush.msra.mxu0 %v3757_v45  ;;  %706 = vmatpush.msrb.mxu1 %v3704_v58  ;;  %v5811_v58 = vand.u32 4294901760, %v3757_v45  ;;  %v4042_v17 = vand.u32 4294901760, %v753_v53  ;;  %v5817_v45 = vand.u32 4294901760, %v5810_v11 }
  0x77   : > { %569 = vmatmul.f32.vlgmr.msra.gmra.mxu2 %v3950_v21  ;;  %608 = vmatmul.f32.vlgmr.msra.gmra.mxu3 %v3965_v29 }
  0x78   : > { %865 = vmatpush.msra.mxu0 %v3775_v62  ;;  %708 = vmatpush.msrb.mxu1 %v5809_v51  ;;  %5814 = vst [vmem:[#allocation14_spill] sm:$0xff] %v4042_v17  ;;  %v5818_v62 = vand.u32 4294901760, %v3806_v55 }
  0x79   : > { %749 = vmatpush.msrb.mxu2 %v3958_v19  ;;  %854 = vmatpush.msrb.mxu3 %v853_v56 }
  0x7a   : > { %868 = vmatpush.msra.mxu0 %v5810_v11  ;;  %710 = vmatpush.msrb.mxu1 %v5812_v26 }
  0x7b   : > { %956 = vmatpush.msra.mxu2 %v5811_v58  ;;  %515 = vmatmul.f32.vlgmr.msra.gmra.mxu1 %v3937_v33  ;;  %v4203_v58 = vand.u32 4294901760, %v324_v35 }
  0x7c   : > { %871 = vmatpush.msra.mxu0 %v3806_v55  ;;  %1023 = vmatpush.msra.mxu3 %v5815_v27  ;;  %v338_v55 = vld [vmem:[#allocation6 + $0x2c8] sm:$0xff] }
  0x7d   : > { %960 = vmatpush.msra.mxu2 %v5813_v47  ;;  %712 = vmatpush.msrb.mxu1 %v5816_v9 }
  0x7e   : > { %874 = vmatpush.msra.mxu0 %v3823_v24  ;;  %1025 = vmatpush.msra.mxu3 %v3744_v38  ;;  %v5821_v24 = vand.u32 4294901760, %v3847_v30 }
  0x7f   : > { %915 = vmatpush.msra.mxu1 %v5815_v27  ;;  %964 = vmatpush.msra.mxu2 %v5817_v45  ;;  %v320_v27 = vld [vmem:[#allocation6 + $0x238] sm:$0xff] }
  0x80   : > { %755 = vmatmul.f32.vlgmr.msrb.gmra.mxu2 %v4042_v17  ;;  %877 = vmatpush.msra.mxu0 %v3838_v43 }
  0x81   : > { %917 = vmatpush.msra.mxu1 %v3744_v38  ;;  %968 = vmatpush.msra.mxu2 %v5818_v62  ;;  %v5820_v38 = vand.u32 4294901760, %v3838_v43  ;;  %v344_v43 = vld [vmem:[#allocation6 + $0x2f8] sm:$0xff] }
  0x82   : > { %1027 = vmatpush.msra.mxu3 %v3759_v48  ;;  %677 = vmatmul.f32.vlgmr.msrb.gmra.mxu0 %v3937_v33 }
  0x83   : > { %856 = vmatmul.f32.vlgmr.msrb.gmra.mxu3 %v3988_v18  ;;  %880 = vmatpush.msra.mxu0 %v3847_v30  ;;  %v340_v30 = vld [vmem:[#allocation6 + $0x2d8] sm:$0xff] }
  0x84   : > { %919 = vmatpush.msra.mxu1 %v3759_v48  ;;  %972 = vmatpush.msra.mxu2 %v5819_v25 }
  0x85   : > { %1029 = vmatpush.msra.mxu3 %v3782_v31  ;;  %714 = vmatmul.f32.vlgmr.msrb.gmra.mxu1 %v3937_v33 }
  0x86   : > { %883 = vmatpush.msra.mxu0 %v3857_v50  ;;  %921 = vmatpush.msra.mxu1 %v3782_v31  ;;  %v5822_v31 = vand.u32 4294901760, %v3857_v50  ;;  %v4114_v50 = vand.u32 4294901760, %v338_v55 }
  0x87   : > { %976 = vmatpush.msra.mxu2 %v5820_v38  ;;  %1031 = vmatpush.msra.mxu3 %v3795_v59 }
  0x88   : > { %886 = vmatpush.msra.mxu0 %v3871_v0  ;;  %923 = vmatpush.msra.mxu1 %v3795_v59  ;;  %v4090_v59 = vand.u32 4294901760, %v344_v43  ;;  %v334_v0 = vld [vmem:[#allocation6 + $0x2a8] sm:$0xff] }
  0x89   : > { %980 = vmatpush.msra.mxu2 %v5821_v24  ;;  %1033 = vmatpush.msra.mxu3 %v3808_v36  ;;  %v318_v24 = vld [vmem:[#allocation6 + $0x228] sm:$0xff] }
  0x8a   : > { %889 = vmatpush.msra.mxu0 %v3884_v54  ;;  %925 = vmatpush.msra.mxu1 %v3808_v36  ;;  %v342_v36 = vld [vmem:[#allocation6 + $0x2e8] sm:$0xff] }
  0x8b   : > { %984 = vmatpush.msra.mxu2 %v5822_v31  ;;  %1035 = vmatpush.msra.mxu3 %v3816_v63  ;;  %v4097_v48 = vand.u32 4294901760, %v342_v36 }
  0x8c   : > { %892 = vmatpush.msra.mxu0 %v3901_v2  ;;  %927 = vmatpush.msra.mxu1 %v3816_v63  ;;  %v336_v63 = vld [vmem:[#allocation6 + $0x2b8] sm:$0xff] }
  0x8d   : > { %988 = vmatpush.msra.mxu2 %v809_v40  ;;  %1037 = vmatpush.msra.mxu3 %v3830_v13  ;;  %v332_v2 = vld [vmem:[#allocation6 + $0x298] sm:$0xff] }
  0x8e   : > { %895 = vmatpush.msra.mxu0 %v3914_v37  ;;  %929 = vmatpush.msra.mxu1 %v3830_v13  ;;  %v4104_v13 = vand.u32 4294901760, %v340_v30  ;;  %v4139_v37 = vsub.f32 %v338_v55, %v4114_v50 }
  0x8f   : > { %992 = vmatpush.msra.mxu2 %v815_v16  ;;  %1039 = vmatpush.msra.mxu3 %v3849_v34 }
  0x90   : > { %898 = vmatpush.msra.mxu0 %v3927_v12  ;;  %931 = vmatpush.msra.mxu1 %v3849_v34  ;;  %v4107_v34 = vsub.f32 %v344_v43, %v4090_v59  ;;  %v4128_v40 = vsub.f32 %v340_v30, %v4104_v13  ;;  %v4149_v12 = vand.u32 4294901760, %v332_v2  ;;  %v4228_v30 = vsub.f32 %v324_v35, %v4203_v58 }
  0x91   : > { %996 = vmatpush.msra.mxu2 %v821_v1  ;;  %1041 = vmatpush.msra.mxu3 %v3859_v52  ;;  %v330_v1 = vld [vmem:[#allocation6 + $0x288] sm:$0xff] }
  0x92   : > { %901 = vmatpush.msra.mxu0 %v3953_v5  ;;  %933 = vmatpush.msra.mxu1 %v3859_v52  ;;  %v4117_v52 = vsub.f32 %v342_v36, %v4097_v48  ;;  %v5711_v54 = vand.u32 4294901760, %v4107_v34  ;;  %v328_v5 = vld [vmem:[#allocation6 + $0x278] sm:$0xff]  ;;  %v4179_v4 = vsub.f32 %v332_v2, %v4149_v12  ;;  %v4225_v36 = vand.u32 4294901760, %v320_v27 }
  0x93   : > { %1000 = vmatpush.msra.mxu2 %v827_v15  ;;  %1043 = vmatpush.msra.mxu3 %v3877_v61  ;;  %v5708_v15 = vand.u32 4294901760, %v4128_v40  ;;  %v4170_v7 = vand.u32 4294901760, %v328_v5  ;;  %v5700_v35 = vand.u32 4294901760, %v4228_v30 }
  0x94   : > { %904 = vmatpush.msra.mxu0 %v3968_v8  ;;  %935 = vmatpush.msra.mxu1 %v3877_v61  ;;  %v4124_v61 = vand.u32 4294901760, %v336_v63  ;;  %v5709_v16 = vand.u32 4294901760, %v4117_v52  ;;  %v4162_v8 = vand.u32 4294901760, %v330_v1  ;;  %v5702_v26 = vand.u32 4294901760, %v4179_v4 }
  0x95   : > { %1004 = vmatpush.msra.mxu2 %v833_v14  ;;  %1045 = vmatpush.msra.mxu3 %v3890_v49  ;;  %v4197_v56 = vsub.f32 %v328_v5, %v4170_v7  ;;  %v376_v5 = vld [vmem:[#allocation6 + $0x3f8] sm:$0xff] }
  0x96   : > { %907 = vmatpush.msra.mxu0 %v3982_v60  ;;  %937 = vmatpush.msra.mxu1 %v3890_v49  ;;  %v4135_v49 = vand.u32 4294901760, %v334_v0  ;;  %v4153_v14 = vsub.f32 %v336_v63, %v4124_v61  ;;  %v4192_v51 = vsub.f32 %v330_v1, %v4162_v8  ;;  %v1139_v43 = vsub.f32 %v4179_v4, %v5702_v26  ;;  %v316_v63 = vld [vmem:[#allocation6 + $0x218] sm:$0xff] }
  0x97   : > { %1008 = vmatpush.msra.mxu2 %v839_v42  ;;  %1047 = vmatpush.msra.mxu3 %v3903_v23  ;;  %v5706_v42 = vand.u32 4294901760, %v4139_v37  ;;  %v5699_v38 = vand.u32 4294901760, %v4197_v56  ;;  %v4237_v1 = vand.u32 4294901760, %v318_v24 }
  0x98   : > { %910 = vmatmul.f32.vlgmr.msra.gmra.mxu0 %v4008_v10  ;;  %939 = vmatpush.msra.mxu1 %v3903_v23  ;;  %v1103_v23 = vsub.f32 %v4107_v34, %v5711_v54  ;;  %v4166_v60 = vsub.f32 %v334_v0, %v4135_v49  ;;  %v5705_v28 = vand.u32 4294901760, %v4153_v14  ;;  %v5701_v25 = vand.u32 4294901760, %v4192_v51 }
  0x99   : > { %1060 = vmatpush.msrb.mxu0 %v4090_v59  ;;  %1012 = vmatpush.msra.mxu2 %v845_v3  ;;  %v326_v3 = vld [vmem:[#allocation6 + $0x268] sm:$0xff]  ;;  %v1121_v41 = vsub.f32 %v4139_v37, %v5706_v42 }
  0x9a   : > { %1049 = vmatpush.msra.mxu3 %v3924_v39  ;;  %941 = vmatpush.msra.mxu1 %v3924_v39  ;;  %v1109_v39 = vsub.f32 %v4117_v52, %v5709_v16  ;;  %v1104_v20 = vand.u32 4294901760, %v1103_v23  ;;  %v5703_v57 = vand.u32 4294901760, %v4166_v60  ;;  %v1127_v11 = vsub.f32 %v4153_v14, %v5705_v28 }
  0x9b   : > { %1062 = vmatpush.msrb.mxu0 %v4097_v48  ;;  %1016 = vmatpush.msra.mxu2 %v851_v22  ;;  %v1115_v22 = vsub.f32 %v4128_v40, %v5708_v15  ;;  %v1122_v9 = vand.u32 4294901760, %v1121_v41  ;;  %v1145_v2 = vsub.f32 %v4192_v51, %v5701_v25 }
  0x9c   : > { %1051 = vmatpush.msra.mxu3 %v3939_v6  ;;  %1018 = vmatmul.f32.vlgmr.msra.gmra.mxu2 %v3988_v18  ;;  %v1110_v44 = vand.u32 4294901760, %v1109_v39  ;;  %v1133_v45 = vsub.f32 %v4166_v60, %v5703_v57  ;;  %v1128_v31 = vand.u32 4294901760, %v1127_v11  ;;  %v1151_v39 = vsub.f32 %v4197_v56, %v5699_v38  ;;  %v370_v38 = vld [vmem:[#allocation6 + $0x3c8] sm:$0xff]  ;;  %v368_v57 = vld [vmem:[#allocation6 + $0x3b8] sm:$0xff] }
  0x9d   : > { %1064 = vmatpush.msrb.mxu0 %v4104_v13  ;;  %1203 = vmatpush.msrb.mxu2 %v4107_v34  ;;  %v1116_v53 = vand.u32 4294901760, %v1115_v22  ;;  %v4248_v22 = vand.u32 4294901760, %v316_v63  ;;  %v1146_v11 = vand.u32 4294901760, %v1145_v2  ;;  %v4310_v42 = vand.u32 4294901760, %v368_v57 }
  0x9e   : > { %943 = vmatpush.msra.mxu1 %v3939_v6  ;;  %1053 = vmatpush.msra.mxu3 %v3958_v19  ;;  %v4183_v6 = vand.u32 4294901760, %v326_v3  ;;  %v1134_v0 = vand.u32 4294901760, %v1133_v45  ;;  %v4266_v45 = vsub.f32 %v318_v24, %v4237_v1 }
  0x9f   : > { %1055 = vmatmul.f32.vlgmr.msra.gmra.mxu3 %v3988_v18  ;;  %1066 = vmatpush.msrb.mxu0 %v4114_v50  ;;  %v5825_v18 = vand.u32 4294901760, %v4107_v34 }
  0xa0   : > { %1206 = vmatpush.msrb.mxu2 %v4117_v52  ;;  %1256 = vmatpush.msrb.mxu3 %v4090_v59  ;;  %v4209_v47 = vsub.f32 %v326_v3, %v4183_v6  ;;  %v314_v3 = vld [vmem:[#allocation6 + $0x208] sm:$0xff] }
  0xa1   : > { %945 = vmatpush.msra.mxu1 %v3958_v19  ;;  %1068 = vmatpush.msrb.mxu0 %v4124_v61  ;;  %v322_v19 = vld [vmem:[#allocation6 + $0x248] sm:$0xff] }
  0xa2   : > { %949 = vmatmul.f32.vlgmr.msra.gmra.mxu1 %v4023_v46  ;;  %1209 = vmatpush.msrb.mxu2 %v4128_v40  ;;  %v4215_v62 = vand.u32 4294901760, %v322_v19  ;;  %v5698_v55 = vand.u32 4294901760, %v4209_v47 }
  0xa3   : > { %1105 = vmatpush.msrb.mxu1 %v1104_v20  ;;  %1258 = vmatpush.msrb.mxu3 %v4097_v48  ;;  %v1140_v20 = vand.u32 4294901760, %v1139_v43  ;;  %v372_v43 = vld [vmem:[#allocation6 + $0x3d8] sm:$0xff] }
  0xa4   : > { %1070 = vmatpush.msrb.mxu0 %v4135_v49  ;;  %1212 = vmatpush.msrb.mxu2 %v4139_v37  ;;  %v4240_v23 = vsub.f32 %v322_v19, %v4215_v62  ;;  %v1157_v41 = vsub.f32 %v4209_v47, %v5698_v55  ;;  %v4259_v19 = vand.u32 4294901760, %v376_v5  ;;  %v4276_v55 = vsub.f32 %v316_v63, %v4248_v22 }
  0xa5   : > { %1111 = vmatpush.msrb.mxu1 %v1110_v44  ;;  %1260 = vmatpush.msrb.mxu3 %v4104_v13  ;;  %v4252_v44 = vsub.f32 %v320_v27, %v4225_v36  ;;  %v5710_v63 = vand.u32 4294901760, %v4266_v45  ;;  %v4293_v26 = vand.u32 4294901760, %v372_v43 }
  0xa6   : > { %1072 = vmatpush.msrb.mxu0 %v4149_v12  ;;  %1215 = vmatpush.msrb.mxu2 %v4153_v14  ;;  %v5704_v27 = vand.u32 4294901760, %v4240_v23 }
  0xa7   : > { %1117 = vmatpush.msrb.mxu1 %v1116_v53  ;;  %1262 = vmatpush.msrb.mxu3 %v4114_v50  ;;  %v374_v53 = vld [vmem:[#allocation6 + $0x3e8] sm:$0xff]  ;;  %v5707_v2 = vand.u32 4294901760, %v4252_v44  ;;  %v4318_v15 = vsub.f32 %v372_v43, %v4293_v26 }
  0xa8   : > { %1074 = vmatpush.msrb.mxu0 %v4162_v8  ;;  %1218 = vmatpush.msrb.mxu2 %v4166_v60  ;;  %v4278_v24 = vand.u32 4294901760, %v374_v53 }
  0xa9   : > { %1123 = vmatpush.msrb.mxu1 %v1122_v9  ;;  %1264 = vmatpush.msrb.mxu3 %v4124_v61  ;;  %v4262_v9 = vand.u32 4294901760, %v314_v3 }
  0xaa   : > { %1076 = vmatpush.msrb.mxu0 %v4170_v7  ;;  %1221 = vmatpush.msrb.mxu2 %v4179_v4  ;;  %5824 = vst [vmem:[#allocation16_spill] sm:$0xff] %v4278_v24 }
  0xab   : > { %1129 = vmatpush.msrb.mxu1 %v1128_v31  ;;  %1266 = vmatpush.msrb.mxu3 %v4135_v49  ;;  %5823 = vst [vmem:[#allocation18_spill] sm:$0xff] %v4262_v9  ;;  %v1152_v31 = vand.u32 4294901760, %v1151_v39  ;;  %v1158_v39 = vand.u32 4294901760, %v1157_v41  ;;  %v4291_v25 = vsub.f32 %v314_v3, %v4262_v9  ;;  %v5712_v3 = vand.u32 4294901760, %v4276_v55 }
  0xac   : > { %1078 = vmatpush.msrb.mxu0 %v4183_v6  ;;  %1224 = vmatpush.msrb.mxu2 %v4192_v51 }
  0xad   : > { %1135 = vmatpush.msrb.mxu1 %v1134_v0  ;;  %1268 = vmatpush.msrb.mxu3 %v4149_v12  ;;  %v1163_v0 = vsub.f32 %v4228_v30, %v5700_v35  ;;  %v1169_v35 = vsub.f32 %v4240_v23, %v5704_v27  ;;  %v4305_v27 = vsub.f32 %v374_v53, %v4278_v24  ;;  %v5718_v53 = vand.u32 4294901760, %v4291_v25 }
  0xae   : > { %1080 = vmatpush.msrb.mxu0 %v4203_v58  ;;  %1227 = vmatpush.msrb.mxu2 %v4197_v56 }
  0xaf   : > { %1141 = vmatpush.msrb.mxu1 %v1140_v20  ;;  %1270 = vmatpush.msrb.mxu3 %v4162_v8  ;;  %v4283_v20 = vsub.f32 %v376_v5, %v4259_v19  ;;  %v4297_v5 = vand.u32 4294901760, %v370_v38  ;;  %v1164_v41 = vand.u32 4294901760, %v1163_v0  ;;  %v1170_v0 = vand.u32 4294901760, %v1169_v35 }
  0xb0   : > { %1082 = vmatpush.msrb.mxu0 %v4215_v62  ;;  %1230 = vmatpush.msrb.mxu2 %v4209_v47  ;;  %v1193_v54 = vsub.f32 %v4291_v25, %v5718_v53 }
  0xb1   : > { %1147 = vmatpush.msrb.mxu1 %v1146_v11  ;;  %1272 = vmatpush.msrb.mxu3 %v4170_v7  ;;  %v1175_v11 = vsub.f32 %v4252_v44, %v5707_v2  ;;  %v5717_v28 = vand.u32 4294901760, %v4283_v20  ;;  %v1181_v2 = vsub.f32 %v4266_v45, %v5710_v63  ;;  %v4323_v16 = vsub.f32 %v370_v38, %v4297_v5 }
  0xb2   : > { %1084 = vmatpush.msrb.mxu0 %v4225_v36  ;;  %1233 = vmatpush.msrb.mxu2 %v4228_v30  ;;  %v1187_v63 = vsub.f32 %v4276_v55, %v5712_v3 }
  0xb3   : > { %1153 = vmatpush.msrb.mxu1 %v1152_v31  ;;  %1274 = vmatpush.msrb.mxu3 %v4183_v6  ;;  %v366_v31 = vld [vmem:[#allocation6 + $0x3a8] sm:$0xff]  ;;  %v1176_v35 = vand.u32 4294901760, %v1175_v11  ;;  %v1444_v38 = vsub.f32 %v4283_v20, %v5717_v28  ;;  %v1182_v3 = vand.u32 4294901760, %v1181_v2  ;;  %v360_v28 = vld [vmem:[#allocation6 + $0x378] sm:$0xff] }
  0xb4   : > { %1086 = vmatpush.msrb.mxu0 %v4237_v1  ;;  %1236 = vmatpush.msrb.mxu2 %v4240_v23  ;;  %v4330_v43 = vand.u32 4294901760, %v366_v31  ;;  %v362_v11 = vld [vmem:[#allocation6 + $0x388] sm:$0xff]  ;;  %v1188_v2 = vand.u32 4294901760, %v1187_v63  ;;  %v1194_v63 = vand.u32 4294901760, %v1193_v54  ;;  %v4371_v29 = vand.u32 4294901760, %v360_v28 }
  0xb5   : > { %1159 = vmatpush.msrb.mxu1 %v1158_v39  ;;  %1276 = vmatpush.msrb.mxu3 %v4203_v58  ;;  %v364_v39 = vld [vmem:[#allocation6 + $0x398] sm:$0xff]  ;;  %v4358_v17 = vand.u32 4294901760, %v362_v11  ;;  %v1445_v34 = vand.u32 4294901760, %v1444_v38  ;;  %v5830_v38 = vand.u32 4294901760, %v4323_v16 }
  0xb6   : > { %1088 = vmatpush.msrb.mxu0 %v4248_v22  ;;  %1239 = vmatpush.msrb.mxu2 %v4252_v44  ;;  %v4345_v10 = vand.u32 4294901760, %v364_v39  ;;  %v4356_v46 = vsub.f32 %v366_v31, %v4330_v43 }
  0xb7   : > { %1165 = vmatpush.msrb.mxu1 %v1164_v41  ;;  %1278 = vmatpush.msrb.mxu3 %v4215_v62  ;;  %v4338_v41 = vsub.f32 %v368_v57, %v4310_v42  ;;  %v358_v57 = vld [vmem:[#allocation6 + $0x368] sm:$0xff] }
  0xb8   : > { %1090 = vmatpush.msrb.mxu0 %v4262_v9  ;;  %1242 = vmatpush.msrb.mxu2 %v4266_v45  ;;  %v4369_v33 = vsub.f32 %v364_v39, %v4345_v10  ;;  %v4382_v39 = vsub.f32 %v362_v11, %v4358_v17  ;;  %v4394_v11 = vsub.f32 %v360_v28, %v4371_v29 }
  0xb9   : > { %1171 = vmatpush.msrb.mxu1 %v1170_v0  ;;  %1280 = vmatpush.msrb.mxu3 %v4225_v36  ;;  %v5826_v0 = vand.u32 4294901760, %v4305_v27 }
  0xba   : > { %1297 = vmatpush.msra.mxu0 %v5825_v18  ;;  %1245 = vmatpush.msrb.mxu2 %v4276_v55  ;;  %v5827_v18 = vand.u32 4294901760, %v4117_v52  ;;  %v5829_v52 = vand.u32 4294901760, %v4128_v40  ;;  %v5831_v40 = vand.u32 4294901760, %v4139_v37  ;;  %v5833_v37 = vand.u32 4294901760, %v4153_v14 }
  0xbb   : > { %1177 = vmatpush.msrb.mxu1 %v1176_v35  ;;  %1282 = vmatpush.msrb.mxu3 %v4237_v1  ;;  %v1450_v53 = vsub.f32 %v4305_v27, %v5826_v0  ;;  %v5828_v0 = vand.u32 4294901760, %v4318_v15  ;;  %v4384_v35 = vand.u32 4294901760, %v358_v57  ;;  %v5835_v14 = vand.u32 4294901760, %v4166_v60 }
  0xbc   : > { %1301 = vmatpush.msra.mxu0 %v5827_v18  ;;  %1248 = vmatpush.msrb.mxu2 %v4291_v25  ;;  %v356_v18 = vld [vmem:[#allocation6 + $0x358] sm:$0xff]  ;;  %v5836_v60 = vand.u32 4294901760, %v4179_v4 }
  0xbd   : > { %1183 = vmatpush.msrb.mxu1 %v1182_v3  ;;  %1284 = vmatpush.msrb.mxu3 %v4248_v22  ;;  %v1456_v31 = vsub.f32 %v4318_v15, %v5828_v0  ;;  %v1462_v3 = vsub.f32 %v4323_v16, %v5830_v38  ;;  %v1451_v54 = vand.u32 4294901760, %v1450_v53  ;;  %v5726_v0 = vand.u32 4294901760, %v4369_v33 }
  0xbe   : > { %1305 = vmatpush.msra.mxu0 %v5829_v52  ;;  %1401 = vmatpush.msra.mxu2 %v4259_v19  ;;  %v5832_v52 = vand.u32 4294901760, %v4338_v41  ;;  %v4407_v28 = vsub.f32 %v358_v57, %v4384_v35 }
  0xbf   : > { %1189 = vmatpush.msrb.mxu1 %v1188_v2  ;;  %1286 = vmatpush.msrb.mxu3 %v4262_v9  ;;  %v354_v2 = vld [vmem:[#allocation6 + $0x348] sm:$0xff]  ;;  %v1457_v53 = vand.u32 4294901760, %v1456_v31  ;;  %v4396_v9 = vand.u32 4294901760, %v356_v18  ;;  %v1485_v31 = vand.u32 4294901760, %v4382_v39 }
  0xc0   : > { %1309 = vmatpush.msra.mxu0 %v5831_v40  ;;  %1403 = vmatpush.msra.mxu2 %v4278_v24  ;;  %v1468_v38 = vsub.f32 %v4338_v41, %v5832_v52  ;;  %v1463_v40 = vand.u32 4294901760, %v1462_v3  ;;  %v352_v24 = vld [vmem:[#allocation6 + $0x338] sm:$0xff]  ;;  %v4409_v52 = vand.u32 4294901760, %v354_v2  ;;  %v1480_v3 = vsub.f32 %v4369_v33, %v5726_v0 }
  0xc1   : > { %1446 = vmatpush.msra.mxu3 %v1445_v34  ;;  %1195 = vmatpush.msrb.mxu1 %v1194_v63  ;;  %v5834_v34 = vand.u32 4294901760, %v4356_v46  ;;  %v4420_v57 = vsub.f32 %v356_v18, %v4396_v9  ;;  %v5837_v0 = vand.u32 4294901760, %v4192_v51  ;;  %v5838_v51 = vand.u32 4294901760, %v4197_v56 }
  0xc2   : > { %1313 = vmatpush.msra.mxu0 %v5833_v37  ;;  %1405 = vmatpush.msra.mxu2 %v4293_v26  ;;  %v4422_v37 = vand.u32 4294901760, %v352_v24  ;;  %v4433_v18 = vsub.f32 %v354_v2, %v4409_v52  ;;  %v1481_v4 = vand.u32 4294901760, %v1480_v3 }
  0xc3   : > { %1364 = vmatpush.msra.mxu1 %v4090_v59  ;;  %1452 = vmatpush.msra.mxu3 %v1451_v54  ;;  %v1474_v63 = vsub.f32 %v4356_v46, %v5834_v34  ;;  %v1469_v59 = vand.u32 4294901760, %v1468_v38  ;;  %v1491_v54 = vand.u32 4294901760, %v4394_v11  ;;  %v350_v34 = vld [vmem:[#allocation6 + $0x328] sm:$0xff]  ;;  %v1486_v38 = vsub.f32 %v4382_v39, %v1485_v31 }
  0xc4   : > { %1317 = vmatpush.msra.mxu0 %v5835_v14  ;;  %1407 = vmatpush.msra.mxu2 %v4297_v5  ;;  %v348_v14 = vld [vmem:[#allocation6 + $0x318] sm:$0xff]  ;;  %v4446_v2 = vsub.f32 %v352_v24, %v4422_v37  ;;  %v5839_v24 = vand.u32 4294901760, %v4209_v47  ;;  %v5840_v47 = vand.u32 4294901760, %v4228_v30 }
  0xc5   : > { %1366 = vmatpush.msra.mxu1 %v4097_v48  ;;  %1458 = vmatpush.msra.mxu3 %v1457_v53  ;;  %v1475_v48 = vand.u32 4294901760, %v1474_v63  ;;  %v1497_v53 = vand.u32 4294901760, %v4407_v28  ;;  %v1503_v63 = vand.u32 4294901760, %v4420_v57 }
  0xc6   : > { %1321 = vmatpush.msra.mxu0 %v5836_v60  ;;  %1409 = vmatpush.msra.mxu2 %v4310_v42  ;;  %v1509_v60 = vand.u32 4294901760, %v4433_v18 }
  0xc7   : > { %1368 = vmatpush.msra.mxu1 %v4104_v13  ;;  %1464 = vmatpush.msra.mxu3 %v1463_v40  ;;  %v4438_v13 = vand.u32 4294901760, %v350_v34  ;;  %v1492_v40 = vsub.f32 %v4394_v11, %v1491_v54  ;;  %v1498_v3 = vsub.f32 %v4407_v28, %v1497_v53 }
  0xc8   : > { %1325 = vmatpush.msra.mxu0 %v5837_v0  ;;  %1411 = vmatpush.msra.mxu2 %v4330_v43  ;;  %v346_v0 = vld [vmem:[#allocation6 + $0x308] sm:$0xff] }
  0xc9   : > { %1370 = vmatpush.msra.mxu1 %v4114_v50  ;;  %1470 = vmatpush.msra.mxu3 %v1469_v59  ;;  %v4451_v50 = vand.u32 4294901760, %v348_v14  ;;  %v1487_v59 = vand.u32 4294901760, %v1486_v38  ;;  %v1493_v56 = vand.u32 4294901760, %v1492_v40  ;;  %v1515_v38 = vand.u32 4294901760, %v4446_v2 }
  0xca   : > { %1329 = vmatpush.msra.mxu0 %v5838_v51  ;;  %1413 = vmatpush.msra.mxu2 %v4345_v10  ;;  %v4469_v51 = vand.u32 4294901760, %v346_v0  ;;  %v5841_v40 = vand.u32 4294901760, %v4240_v23 }
  0xcb   : > { %1372 = vmatpush.msra.mxu1 %v4124_v61  ;;  %1476 = vmatpush.msra.mxu3 %v1475_v48  ;;  %v4462_v61 = vsub.f32 %v350_v34, %v4438_v13  ;;  %v1504_v48 = vsub.f32 %v4420_v57, %v1503_v63  ;;  %v1499_v34 = vand.u32 4294901760, %v1498_v3  ;;  %v5842_v3 = vand.u32 4294901760, %v4252_v44 }
  0xcc   : > { %1333 = vmatpush.msra.mxu0 %v5839_v24  ;;  %1415 = vmatpush.msra.mxu2 %v4358_v17  ;;  %v5843_v24 = vand.u32 4294901760, %v4266_v45 }
  0xcd   : > { %1374 = vmatpush.msra.mxu1 %v4135_v49  ;;  %1482 = vmatpush.msra.mxu3 %v1481_v4  ;;  %v4475_v49 = vsub.f32 %v348_v14, %v4451_v50  ;;  %v1510_v4 = vsub.f32 %v4433_v18, %v1509_v60  ;;  %v1521_v30 = vand.u32 4294901760, %v4462_v61  ;;  %v1516_v14 = vsub.f32 %v4446_v2, %v1515_v38 }
  0xce   : > { %1337 = vmatpush.msra.mxu0 %v5840_v47  ;;  %1417 = vmatpush.msra.mxu2 %v4371_v29  ;;  %v5853_v47 = vld [vmem:[#allocation14_spill] sm:$0xff] }
  0xcf   : > { %1376 = vmatpush.msra.mxu1 %v4149_v12  ;;  %1488 = vmatpush.msra.mxu3 %v1487_v59  ;;  %v1505_v12 = vand.u32 4294901760, %v1504_v48  ;;  %v4490_v59 = vsub.f32 %v346_v0, %v4469_v51  ;;  %v1511_v23 = vand.u32 4294901760, %v1510_v4  ;;  %v1522_v0 = vsub.f32 %v4462_v61, %v1521_v30 }
  0xd0   : > { %1341 = vmatpush.msra.mxu0 %v5841_v40  ;;  %1419 = vmatpush.msra.mxu2 %v4384_v35  ;;  %v1517_v44 = vand.u32 4294901760, %v1516_v14 }
  0xd1   : > { %1378 = vmatpush.msra.mxu1 %v4162_v8  ;;  %1494 = vmatpush.msra.mxu3 %v1493_v56  ;;  %v1527_v8 = vand.u32 4294901760, %v4475_v49  ;;  %v5844_v56 = vand.u32 4294901760, %v4276_v55  ;;  %v1523_v48 = vand.u32 4294901760, %v1522_v0 }
  0xd2   : > { %1345 = vmatpush.msra.mxu0 %v5842_v3  ;;  %1421 = vmatpush.msra.mxu2 %v4396_v9 }
  0xd3   : > { %1380 = vmatpush.msra.mxu1 %v4170_v7  ;;  %1500 = vmatpush.msra.mxu3 %v1499_v34  ;;  %v1533_v7 = vand.u32 4294901760, %v4490_v59  ;;  %v1528_v45 = vsub.f32 %v4475_v49, %v1527_v8  ;;  %v5855_v34 = vld [vmem:[#allocation21_spill] sm:$0xff] }
  0xd4   : > { %1349 = vmatpush.msra.mxu0 %v5843_v24  ;;  %1423 = vmatpush.msra.mxu2 %v4409_v52 }
  0xd5   : > { %1382 = vmatpush.msra.mxu1 %v4183_v6  ;;  %1506 = vmatpush.msra.mxu3 %v1505_v12  ;;  %v5845_v6 = vand.u32 4294901760, %v4291_v25  ;;  %v1529_v55 = vand.u32 4294901760, %v1528_v45  ;;  %v5846_v25 = vld [vmem:[#allocation20_spill] sm:$0xff]  ;;  %v258_v45 = vld [vmem:[#allocation6 + $0x50] sm:$0xff] }
  0xd6   : > { %1353 = vmatpush.msra.mxu0 %v5844_v56  ;;  %1425 = vmatpush.msra.mxu2 %v4422_v37 }
  0xd7   : > { %1384 = vmatpush.msra.mxu1 %v4203_v58  ;;  %1512 = vmatpush.msra.mxu3 %v1511_v23  ;;  %v1534_v58 = vsub.f32 %v4490_v59, %v1533_v7 }
  0xd8   : > { %1357 = vmatpush.msra.mxu0 %v5845_v6  ;;  %1427 = vmatpush.msra.mxu2 %v4438_v13 }
  0xd9   : > { %1386 = vmatpush.msra.mxu1 %v4215_v62  ;;  %1518 = vmatpush.msra.mxu3 %v1517_v44  ;;  %v1535_v62 = vand.u32 4294901760, %v1534_v58 }
  0xda   : > { %1096 = vmatmul.f32.vlgmr.msrb.gmra.mxu0 %v4002_v32  ;;  %1429 = vmatpush.msra.mxu2 %v4451_v50  ;;  %v5847_v32 = vand.u32 4294901760, %v4283_v20 }
  0xdb   : > { %1388 = vmatpush.msra.mxu1 %v4225_v36  ;;  %1544 = vmatpush.msrb.mxu0 %v4283_v20  ;;  %v5848_v36 = vld [vmem:[#allocation19_spill] sm:$0xff]  ;;  %v5851_v20 = vand.u32 4294901760, %v4318_v15 }
  0xdc   : > { %1524 = vmatpush.msra.mxu3 %v1523_v48  ;;  %1251 = vmatmul.f32.vlgmr.msrb.gmra.mxu2 %v3950_v21  ;;  %v5849_v21 = vand.u32 4294901760, %v4305_v27 }
  0xdd   : > { %1547 = vmatpush.msrb.mxu0 %v4305_v27  ;;  %1390 = vmatpush.msra.mxu1 %v4237_v1  ;;  %v5850_v1 = vld [vmem:[#allocation18_spill] sm:$0xff]  ;;  %v5854_v27 = vand.u32 4294901760, %v4323_v16 }
  0xde   : > { %1431 = vmatpush.msra.mxu2 %v4469_v51  ;;  %1530 = vmatpush.msra.mxu3 %v1529_v55 }
  0xdf   : > { %1290 = vmatmul.f32.vlgmr.msrb.gmra.mxu3 %v5846_v25  ;;  %1550 = vmatpush.msrb.mxu0 %v4318_v15  ;;  %v5856_v15 = vand.u32 4294901760, %v4338_v41  ;;  %v256_v25 = vld [vmem:[#allocation6 + $0x40] sm:$0xff] }
  0xe0   : > { %1638 = vmatpush.msrb.mxu2 %v5847_v32  ;;  %1392 = vmatpush.msra.mxu1 %v4248_v22  ;;  %v5852_v22 = vld [vmem:[#allocation16_spill] sm:$0xff] }
  0xe1   : > { %1536 = vmatpush.msra.mxu3 %v1535_v62  ;;  %1197 = vmatmul.f32.vlgmr.msrb.gmra.mxu1 %v5848_v36  ;;  %v5861_v62 = vld [vmem:[#allocation23_spill] sm:$0xff] }
  0xe2   : > { %1553 = vmatpush.msrb.mxu0 %v4323_v16  ;;  %1642 = vmatpush.msrb.mxu2 %v5849_v21  ;;  %v5857_v16 = vand.u32 4294901760, %v4356_v46  ;;  %v4694_v21 = vand.u32 4294901760, %v258_v45 }
  0xe3   : > { %1705 = vmatpush.msrb.mxu3 %v4259_v19  ;;  %1394 = vmatpush.msra.mxu1 %v5850_v1 }
  0xe4   : > { %1556 = vmatpush.msrb.mxu0 %v4338_v41  ;;  %1646 = vmatpush.msrb.mxu2 %v5851_v20  ;;  %v272_v41 = vld [vmem:[#allocation6 + $0xc0] sm:$0xff] }
  0xe5   : > { %1597 = vmatpush.msrb.mxu1 %v4259_v19  ;;  %1707 = vmatpush.msrb.mxu3 %v5852_v22 }
  0xe6   : > { %1437 = vmatmul.f32.vlgmr.msra.gmra.mxu2 %v5853_v47  ;;  %1559 = vmatpush.msrb.mxu0 %v4356_v46  ;;  %v5859_v46 = vld [vmem:[#allocation12_spill] sm:$0xff]  ;;  %v254_v47 = vld [vmem:[#allocation6 + $0x30] sm:$0xff] }
  0xe7   : > { %1599 = vmatpush.msrb.mxu1 %v5852_v22  ;;  %1650 = vmatpush.msrb.mxu2 %v5854_v27  ;;  %v215_v19 = vsel %vm214_vm0, %v5859_v46, -inf  ;;  %v252_v46 = vld [vmem:[#allocation6 + $0x20] sm:$0xff] }
  0xe8   : > { %1709 = vmatpush.msrb.mxu3 %v4293_v26  ;;  %1359 = vmatmul.f32.vlgmr.msra.gmra.mxu0 %v5848_v36 }
  0xe9   : > { %1538 = vmatmul.f32.vlgmr.msra.gmra.mxu3 %v5855_v34  ;;  %1562 = vmatpush.msrb.mxu0 %v4369_v33 }
  0xea   : > { %1601 = vmatpush.msrb.mxu1 %v4293_v26  ;;  %1654 = vmatpush.msrb.mxu2 %v5856_v15  ;;  %v5858_v26 = vand.u32 4294901760, %v4369_v33  ;;  %v278_v33 = vld [vmem:[#allocation6 + $0xf0] sm:$0xff]  ;;  %v4709_v15 = vand.u32 4294901760, %v256_v25 }
  0xeb   : > { %1711 = vmatpush.msrb.mxu3 %v4297_v5  ;;  %1396 = vmatmul.f32.vlgmr.msra.gmra.mxu1 %v5848_v36 }
  0xec   : > { %1565 = vmatpush.msrb.mxu0 %v4382_v39  ;;  %1603 = vmatpush.msrb.mxu1 %v4297_v5  ;;  %v216_v5 = vrot.slane %v215_v19, 4 }
  0xed   : > { %1658 = vmatpush.msrb.mxu2 %v5857_v16  ;;  %1713 = vmatpush.msrb.mxu3 %v4310_v42 }
  0xee   : > { %1568 = vmatpush.msrb.mxu0 %v4394_v11  ;;  %1605 = vmatpush.msrb.mxu1 %v4310_v42  ;;  %v276_v42 = vld [vmem:[#allocation6 + $0xe0] sm:$0xff]  ;;  %v217_v39 = vmax.f32 %v215_v19, %v216_v5 }
  0xef   : > { %1662 = vmatpush.msrb.mxu2 %v5858_v26  ;;  %1715 = vmatpush.msrb.mxu3 %v4330_v43 }
  0xf0   : > { %1571 = vmatpush.msrb.mxu0 %v4407_v28  ;;  %1607 = vmatpush.msrb.mxu1 %v4330_v43  ;;  %v4584_v43 = vand.u32 4294901760, %v278_v33 }
  0xf1   : > { %1666 = vmatpush.msrb.mxu2 %v1485_v31  ;;  %1717 = vmatpush.msrb.mxu3 %v4345_v10  ;;  %v270_v31 = vld [vmem:[#allocation6 + $0xb0] sm:$0xff] }
  0xf2   : > { %1574 = vmatpush.msrb.mxu0 %v4420_v57  ;;  %1609 = vmatpush.msrb.mxu1 %v4345_v10  ;;  %v274_v10 = vld [vmem:[#allocation6 + $0xd0] sm:$0xff]  ;;  %v4601_v11 = vsub.f32 %v278_v33, %v4584_v43  ;;  %v268_v57 = vld [vmem:[#allocation6 + $0xa0] sm:$0xff] }
  0xf3   : > { %1670 = vmatpush.msrb.mxu2 %v1491_v54  ;;  %1719 = vmatpush.msrb.mxu3 %v4358_v17  ;;  %v4615_v54 = vand.u32 4294901760, %v270_v31 }
  0xf4   : > { %1577 = vmatpush.msrb.mxu0 %v4433_v18  ;;  %1611 = vmatpush.msrb.mxu1 %v4358_v17  ;;  %v4591_v17 = vand.u32 4294901760, %v276_v42 }
  0xf5   : > { %1674 = vmatpush.msrb.mxu2 %v1497_v53  ;;  %1721 = vmatpush.msrb.mxu3 %v4371_v29  ;;  %v218_v53 = vrot.slane %v217_v39, 2 }
  0xf6   : > { %1580 = vmatpush.msrb.mxu0 %v4446_v2  ;;  %1613 = vmatpush.msrb.mxu1 %v4371_v29  ;;  %v4598_v29 = vand.u32 4294901760, %v274_v10  ;;  %v4611_v28 = vsub.f32 %v276_v42, %v4591_v17  ;;  %v266_v2 = vld [vmem:[#allocation6 + $0x90] sm:$0xff]  ;;  %v4720_v42 = vand.u32 4294901760, %v254_v47 }
  0xf7   : > { %1678 = vmatpush.msrb.mxu2 %v1503_v63  ;;  %1723 = vmatpush.msrb.mxu3 %v4384_v35  ;;  %v5860_v63 = vld [vmem:[#allocation22_spill] sm:$0xff]  ;;  %v219_v4 = vmax.f32 %v217_v39, %v218_v53  ;;  %v4646_v40 = vand.u32 4294901760, %v266_v2  ;;  %v4736_v53 = vsub.f32 %v256_v25, %v4709_v15 }
  0xf8   : > { %1583 = vmatpush.msrb.mxu0 %v4462_v61  ;;  %1615 = vmatpush.msrb.mxu1 %v4384_v35  ;;  %v4608_v35 = vand.u32 4294901760, %v272_v41  ;;  %v4622_v18 = vsub.f32 %v274_v10, %v4598_v29  ;;  %v4724_v10 = vsub.f32 %v258_v45, %v4694_v21 }
  0xf9   : > { %1682 = vmatpush.msrb.mxu2 %v1509_v60  ;;  %1725 = vmatpush.msrb.mxu3 %v4396_v9  ;;  %v5741_v60 = vand.u32 4294901760, %v4611_v28  ;;  %v220_v24 = vrot.slane %v219_v4, 1  ;;  %v4673_v56 = vsub.f32 %v266_v2, %v4646_v40  ;;  %v5727_v45 = vand.u32 4294901760, %v4736_v53 }
  0xfa   : > { %1586 = vmatpush.msrb.mxu0 %v4475_v49  ;;  %1617 = vmatpush.msrb.mxu1 %v4396_v9  ;;  %v1784_v9 = vand.u32 4294901760, %v4601_v11  ;;  %v4633_v61 = vsub.f32 %v272_v41, %v4608_v35 }
  0xfb   : > { %1686 = vmatpush.msrb.mxu2 %v1515_v38  ;;  %1727 = vmatpush.msrb.mxu3 %v4409_v52  ;;  %v4638_v38 = vsub.f32 %v270_v31, %v4615_v54  ;;  %v1791_v12 = vsub.f32 %v4611_v28, %v5741_v60  ;;  %v221_v32 = vmax.f32 %v219_v4, %v220_v24  ;;  %v5733_v1 = vand.u32 4294901760, %v4673_v56 }
  0xfc   : > { %1589 = vmatpush.msrb.mxu0 %v4490_v59  ;;  %1619 = vmatpush.msrb.mxu1 %v4409_v52  ;;  %v4629_v52 = vand.u32 4294901760, %v268_v57  ;;  %v1785_v49 = vsub.f32 %v4601_v11, %v1784_v9  ;;  %v5737_v59 = vand.u32 4294901760, %v4633_v61 }
  0xfd   : > { %1690 = vmatpush.msrb.mxu2 %v1521_v30  ;;  %1729 = vmatpush.msrb.mxu3 %v4422_v37  ;;  %v5738_v30 = vand.u32 4294901760, %v4622_v18  ;;  %v5736_v23 = vand.u32 4294901760, %v4638_v38  ;;  %v1792_v6 = vand.u32 4294901760, %v1791_v12  ;;  %v4714_v19 = vand.u32 4294901760, %v221_v32  ;;  %v310_v12 = vld [vmem:[#allocation6 + $0x1f0] sm:$0xff] }
  0xfe   : > { %1592 = vmatmul.f32.vlgmr.msrb.gmra.mxu0 %v5860_v63  ;;  %1621 = vmatpush.msrb.mxu1 %v4422_v37  ;;  %v264_v37 = vld [vmem:[#allocation6 + $0x80] sm:$0xff]  ;;  %v4660_v3 = vsub.f32 %v268_v57, %v4629_v52  ;;  %v1786_v0 = vand.u32 4294901760, %v1785_v49  ;;  %v1803_v48 = vsub.f32 %v4633_v61, %v5737_v59  ;;  %v1821_v33 = vsub.f32 %v4673_v56, %v5733_v1  ;;  %v250_v63 = vld [vmem:[#allocation6 + $0x10] sm:$0xff] }
  0xff   : > { %1742 = vmatpush.msra.mxu0 %v4584_v43  ;;  %1694 = vmatpush.msrb.mxu2 %v1527_v8  ;;  %v4656_v14 = vand.u32 4294901760, %v264_v37  ;;  %v260_v8 = vld [vmem:[#allocation6 + $0x60] sm:$0xff]  ;;  %v1797_v44 = vsub.f32 %v4622_v18, %v5738_v30  ;;  %v4733_v57 = vand.u32 4294901760, %v252_v46  ;;  %v4741_v2 = vsub.f32 %v221_v32, %v4714_v19 }
 0x100   : > { %1731 = vmatpush.msrb.mxu3 %v4438_v13  ;;  %1623 = vmatpush.msrb.mxu1 %v4438_v13  ;;  %v262_v13 = vld [vmem:[#allocation6 + $0x70] sm:$0xff]  ;;  %v5734_v58 = vand.u32 4294901760, %v4660_v3  ;;  %v1804_v27 = vand.u32 4294901760, %v1803_v48  ;;  %v5728_v49 = vand.u32 4294901760, %v4724_v10  ;;  %v4756_v24 = vand.u32 4294901760, %v250_v63 }
 0x101   : > { %1744 = vmatpush.msra.mxu0 %v4591_v17  ;;  %1698 = vmatpush.msrb.mxu2 %v1533_v7  ;;  %v4670_v7 = vand.u32 4294901760, %v262_v13  ;;  %v4686_v55 = vsub.f32 %v264_v37, %v4656_v14  ;;  %v1798_v36 = vand.u32 4294901760, %v1797_v44  ;;  %5862 = vst [vmem:[#allocation15_spill] sm:$0xff] %v4741_v2  ;;  %v1822_v37 = vand.u32 4294901760, %v1821_v33 }
 0x102   : > { %1733 = vmatpush.msrb.mxu3 %v4451_v50  ;;  %1700 = vmatmul.f32.vlgmr.msrb.gmra.mxu2 %v5855_v34  ;;  %5863 = vst [vmem:[#allocation17_spill] sm:$0xff] %v4756_v24  ;;  %v4766_v48 = vand.u32 4294901760, %v4741_v2  ;;  %v1845_v32 = vsub.f32 %v4724_v10, %v5728_v49 }
 0x103   : > { %1746 = vmatpush.msra.mxu0 %v4598_v29  ;;  %1885 = vmatpush.msra.mxu2 %v4601_v11  ;;  %v4698_v20 = vsub.f32 %v262_v13, %v4670_v7  ;;  %v5732_v16 = vand.u32 4294901760, %v4686_v55  ;;  %v4749_v13 = vsub.f32 %v254_v47, %v4720_v42  ;;  %v5868_v11 = vand.u32 4294901760, %v4611_v28 }
 0x104   : > { %1625 = vmatpush.msrb.mxu1 %v4451_v50  ;;  %1735 = vmatpush.msrb.mxu3 %v4469_v51  ;;  %v4677_v50 = vand.u32 4294901760, %v260_v8  ;;  %5864 = vst [vmem:[#allocation20_spill] sm:$0xff] %v4766_v48 }
 0x105   : > { %1737 = vmatmul.f32.vlgmr.msrb.gmra.mxu3 %v5855_v34  ;;  %1748 = vmatpush.msra.mxu0 %v4608_v35  ;;  %v1815_v34 = vsub.f32 %v4660_v3, %v5734_v58  ;;  %v5730_v5 = vand.u32 4294901760, %v4698_v20  ;;  %v1827_v31 = vsub.f32 %v4686_v55, %v5732_v16  ;;  %v5731_v47 = vand.u32 4294901760, %v4749_v13 }
 0x106   : > { %1888 = vmatpush.msra.mxu2 %v4611_v28  ;;  %1938 = vmatpush.msra.mxu3 %v4584_v43  ;;  %v4703_v22 = vsub.f32 %v260_v8, %v4677_v50  ;;  %v5870_v28 = vand.u32 4294901760, %v4622_v18 }
 0x107   : > { %1627 = vmatpush.msrb.mxu1 %v4469_v51  ;;  %1750 = vmatpush.msra.mxu0 %v4615_v54  ;;  %v1809_v51 = vsub.f32 %v4638_v38, %v5736_v23  ;;  %v1816_v39 = vand.u32 4294901760, %v1815_v34  ;;  %v1833_v4 = vsub.f32 %v4698_v20, %v5730_v5  ;;  %v1828_v44 = vand.u32 4294901760, %v1827_v31  ;;  %v304_v31 = vld [vmem:[#allocation6 + $0x1c0] sm:$0xff] }
 0x108   : > { %1631 = vmatmul.f32.vlgmr.msrb.gmra.mxu1 %v5861_v62  ;;  %1891 = vmatpush.msra.mxu2 %v4622_v18  ;;  %v5729_v41 = vand.u32 4294901760, %v4703_v22  ;;  %v4768_v62 = vand.u32 4294901760, %v310_v12  ;;  %v4780_v34 = vsub.f32 %v250_v63, %v4756_v24  ;;  %v1776_v63 = vsub.f32 %v4741_v2, %v4766_v48 }
 0x109   : > { %1787 = vmatpush.msra.mxu1 %v1786_v0  ;;  %1940 = vmatpush.msra.mxu3 %v4591_v17  ;;  %v1810_v26 = vand.u32 4294901760, %v1809_v51  ;;  %v248_v0 = vld [vmem:[#allocation6] sm:$0xff]  ;;  %v1834_v25 = vand.u32 4294901760, %v1833_v4 }
 0x10a   : > { %1752 = vmatpush.msra.mxu0 %v4629_v52  ;;  %1894 = vmatpush.msra.mxu2 %v4633_v61  ;;  %v1839_v8 = vsub.f32 %v4703_v22, %v5729_v41  ;;  %v308_v51 = vld [vmem:[#allocation6 + $0x1e0] sm:$0xff]  ;;  %v302_v41 = vld [vmem:[#allocation6 + $0x1b0] sm:$0xff]  ;;  %v4821_v16 = vand.u32 4294901760, %v1776_v63 }
 0x10b   : > { %1793 = vmatpush.msra.mxu1 %v1792_v6  ;;  %1942 = vmatpush.msra.mxu3 %v4598_v29  ;;  %v4761_v6 = vsub.f32 %v252_v46, %v4733_v57  ;;  %v1851_v46 = vsub.f32 %v4736_v53, %v5727_v45  ;;  %v1857_v45 = vsub.f32 %v4749_v13, %v5731_v47  ;;  %v4824_v58 = vand.u32 4294901760, %v302_v41 }
 0x10c   : > { %1754 = vmatpush.msra.mxu0 %v4646_v40  ;;  %1897 = vmatpush.msra.mxu2 %v4638_v38  ;;  %5867 = vst [vmem:[#allocation18_spill] sm:$0xff] %v4821_v16 }
 0x10d   : > { %1799 = vmatpush.msra.mxu1 %v1798_v36  ;;  %1944 = vmatpush.msra.mxu3 %v4608_v35  ;;  %v4774_v36 = vand.u32 4294901760, %v248_v0  ;;  %v5735_v33 = vand.u32 4294901760, %v4761_v6 }
 0x10e   : > { %1756 = vmatpush.msra.mxu0 %v4656_v14  ;;  %1900 = vmatpush.msra.mxu2 %v4660_v3 }
 0x10f   : > { %1805 = vmatpush.msra.mxu1 %v1804_v27  ;;  %1946 = vmatpush.msra.mxu3 %v4615_v54  ;;  %v1840_v27 = vand.u32 4294901760, %v1839_v8  ;;  %v4796_v8 = vsub.f32 %v310_v12, %v4768_v62  ;;  %v5739_v12 = vand.u32 4294901760, %v4780_v34 }
 0x110   : > { %1758 = vmatpush.msra.mxu0 %v4670_v7  ;;  %1903 = vmatpush.msra.mxu2 %v4673_v56 }
 0x111   : > { %1811 = vmatpush.msra.mxu1 %v1810_v26  ;;  %1948 = vmatpush.msra.mxu3 %v4629_v52  ;;  %v306_v26 = vld [vmem:[#allocation6 + $0x1d0] sm:$0xff]  ;;  %v5740_v1 = vand.u32 4294901760, %v4796_v8  ;;  %v1869_v63 = vsub.f32 %v4780_v34, %v5739_v12 }
 0x112   : > { %1760 = vmatpush.msra.mxu0 %v4677_v50  ;;  %1906 = vmatpush.msra.mxu2 %v4686_v55  ;;  %v4805_v49 = vand.u32 4294901760, %v306_v26 }
 0x113   : > { %1817 = vmatpush.msra.mxu1 %v1816_v39  ;;  %1950 = vmatpush.msra.mxu3 %v4646_v40  ;;  %v4787_v39 = vand.u32 4294901760, %v308_v51  ;;  %v2126_v12 = vsub.f32 %v4796_v8, %v5740_v1  ;;  %v1870_v1 = vand.u32 4294901760, %v1869_v63 }
 0x114   : > { %1762 = vmatpush.msra.mxu0 %v4694_v21  ;;  %1909 = vmatpush.msra.mxu2 %v4698_v20  ;;  %5866 = vst [vmem:[#allocation19_spill] sm:$0xff] %v4805_v49 }
 0x115   : > { %1823 = vmatpush.msra.mxu1 %v1822_v37  ;;  %1952 = vmatpush.msra.mxu3 %v4656_v14  ;;  %v5865_v37 = vld [vmem:[#allocation13_spill] sm:$0xff]  ;;  %v4817_v47 = vsub.f32 %v308_v51, %v4787_v39  ;;  %v4829_v51 = vsub.f32 %v306_v26, %v4805_v49  ;;  %v2127_v63 = vand.u32 4294901760, %v2126_v12 }
 0x116   : > { %1764 = vmatpush.msra.mxu0 %v4709_v15  ;;  %1912 = vmatpush.msra.mxu2 %v4703_v22  ;;  %v222_v4 = vsel %vm214_vm0, %v5865_v37, -inf  ;;  %v4803_v37 = vsub.f32 %v248_v0, %v4774_v36  ;;  %v1863_v0 = vsub.f32 %v4761_v6, %v5735_v33  ;;  %v294_v26 = vld [vmem:[#allocation6 + $0x170] sm:$0xff] }
 0x117   : > { %1829 = vmatpush.msra.mxu1 %v1828_v44  ;;  %1954 = vmatpush.msra.mxu3 %v4670_v7  ;;  %v1846_v44 = vand.u32 4294901760, %v1845_v32  ;;  %v223_v5 = vrot.slane %v222_v4, 4  ;;  %v1852_v32 = vand.u32 4294901760, %v1851_v46  ;;  %v1858_v46 = vand.u32 4294901760, %v1857_v45 }
 0x118   : > { %1766 = vmatpush.msra.mxu0 %v4720_v42  ;;  %1915 = vmatpush.msra.mxu2 %v4724_v10  ;;  %v5742_v33 = vand.u32 4294901760, %v4803_v37  ;;  %v1864_v45 = vand.u32 4294901760, %v1863_v0 }
 0x119   : > { %1835 = vmatpush.msra.mxu1 %v1834_v25  ;;  %1956 = vmatpush.msra.mxu3 %v4677_v50  ;;  %v4810_v25 = vand.u32 4294901760, %v304_v31  ;;  %v224_v59 = vmax.f32 %v222_v4, %v223_v5  ;;  %v296_v5 = vld [vmem:[#allocation6 + $0x180] sm:$0xff] }
 0x11a   : > { %1768 = vmatpush.msra.mxu0 %v4733_v57  ;;  %1918 = vmatpush.msra.mxu2 %v4736_v53  ;;  %v1875_v4 = vsub.f32 %v4803_v37, %v5742_v33 }
 0x11b   : > { %1841 = vmatpush.msra.mxu1 %v1840_v27  ;;  %1958 = vmatpush.msra.mxu3 %v4694_v21  ;;  %v300_v27 = vld [vmem:[#allocation6 + $0x1a0] sm:$0xff]  ;;  %v4837_v23 = vsub.f32 %v304_v31, %v4810_v25  ;;  %v4849_v31 = vsub.f32 %v302_v41, %v4824_v58  ;;  %v225_v60 = vrot.slane %v224_v59, 2 }
 0x11c   : > { %1770 = vmatpush.msra.mxu0 %v4756_v24  ;;  %1921 = vmatpush.msra.mxu2 %v4749_v13  ;;  %v4841_v30 = vand.u32 4294901760, %v300_v27 }
 0x11d   : > { %1847 = vmatpush.msra.mxu1 %v1846_v44  ;;  %1960 = vmatpush.msra.mxu3 %v4709_v15  ;;  %v298_v44 = vld [vmem:[#allocation6 + $0x190] sm:$0xff]  ;;  %v5872_v12 = vand.u32 4294901760, %v4837_v23  ;;  %v226_v41 = vmax.f32 %v224_v59, %v225_v60  ;;  %v288_v59 = vld [vmem:[#allocation6 + $0x140] sm:$0xff] }
 0x11e   : > { %1772 = vmatpush.msra.mxu0 %v4774_v36  ;;  %1924 = vmatpush.msra.mxu2 %v4761_v6  ;;  %v4857_v0 = vand.u32 4294901760, %v298_v44  ;;  %v4868_v33 = vsub.f32 %v300_v27, %v4841_v30 }
 0x11f   : > { %1853 = vmatpush.msra.mxu1 %v1852_v32  ;;  %1962 = vmatpush.msra.mxu3 %v4720_v42  ;;  %v4870_v32 = vand.u32 4294901760, %v296_v5  ;;  %v2144_v18 = vsub.f32 %v4837_v23, %v5872_v12  ;;  %v5874_v12 = vand.u32 4294901760, %v4849_v31 }
 0x120   : > { %1778 = vmatmul.f32.vlgmr.msra.gmra.mxu0 %v4821_v16  ;;  %1927 = vmatpush.msra.mxu2 %v4780_v34  ;;  %v292_v16 = vld [vmem:[#allocation6 + $0x160] sm:$0xff] }
 0x121   : > { %1979 = vmatpush.msrb.mxu0 %v1784_v9  ;;  %1859 = vmatpush.msra.mxu1 %v1858_v46  ;;  %v5869_v9 = vand.u32 4294901760, %v4817_v47  ;;  %v2150_v60 = vsub.f32 %v4849_v31, %v5874_v12  ;;  %v227_v12 = vrot.slane %v226_v41, 1 }
 0x122   : > { %1964 = vmatpush.msra.mxu3 %v4733_v57  ;;  %1930 = vmatpush.msra.mxu2 %v4803_v37 }
 0x123   : > { %1983 = vmatpush.msrb.mxu0 %v5868_v11  ;;  %1865 = vmatpush.msra.mxu1 %v1864_v45  ;;  %v2132_v46 = vsub.f32 %v4817_v47, %v5869_v9  ;;  %v1876_v45 = vand.u32 4294901760, %v1875_v4  ;;  %v5871_v11 = vand.u32 4294901760, %v4829_v51  ;;  %v4882_v9 = vsub.f32 %v298_v44, %v4857_v0 }
 0x124   : > { %1966 = vmatpush.msra.mxu3 %v4756_v24  ;;  %1933 = vmatmul.f32.vlgmr.msra.gmra.mxu2 %v4741_v2  ;;  %v4884_v24 = vand.u32 4294901760, %v294_v26  ;;  %v5873_v4 = vand.u32 4294901760, %v4633_v61  ;;  %v4895_v2 = vsub.f32 %v296_v5, %v4870_v32  ;;  %v5875_v61 = vand.u32 4294901760, %v4638_v38 }
 0x125   : > { %1987 = vmatpush.msrb.mxu0 %v5870_v28  ;;  %2083 = vmatpush.msrb.mxu2 %v4768_v62  ;;  %v2138_v27 = vsub.f32 %v4829_v51, %v5871_v11  ;;  %v290_v28 = vld [vmem:[#allocation6 + $0x150] sm:$0xff]  ;;  %v2133_v11 = vand.u32 4294901760, %v2132_v46  ;;  %v5876_v38 = vand.u32 4294901760, %v4868_v33 }
 0x126   : > { %1871 = vmatpush.msra.mxu1 %v1870_v1  ;;  %1968 = vmatpush.msra.mxu3 %v4774_v36  ;;  %v4897_v1 = vand.u32 4294901760, %v292_v16  ;;  %v4907_v5 = vsub.f32 %v294_v26, %v4884_v24  ;;  %v4909_v44 = vand.u32 4294901760, %v290_v28 }
 0x127   : > { %1972 = vmatmul.f32.vlgmr.msra.gmra.mxu3 %v4766_v48  ;;  %1991 = vmatpush.msrb.mxu0 %v5873_v4  ;;  %v2139_v46 = vand.u32 4294901760, %v2138_v27  ;;  %v286_v48 = vld [vmem:[#allocation6 + $0x130] sm:$0xff]  ;;  %v5877_v4 = vand.u32 4294901760, %v4660_v3  ;;  %v5879_v3 = vand.u32 4294901760, %v4673_v56  ;;  %v5881_v56 = vand.u32 4294901760, %v4686_v55 }
 0x128   : > { %2085 = vmatpush.msrb.mxu2 %v4787_v39  ;;  %2128 = vmatpush.msrb.mxu3 %v2127_v63  ;;  %v2145_v63 = vand.u32 4294901760, %v2144_v18  ;;  %v4919_v26 = vsub.f32 %v292_v16, %v4897_v1  ;;  %v2151_v18 = vand.u32 4294901760, %v2150_v60  ;;  %v4932_v16 = vsub.f32 %v290_v28, %v4909_v44 }
 0x129   : > { %1877 = vmatpush.msra.mxu1 %v1876_v45  ;;  %1995 = vmatpush.msrb.mxu0 %v5875_v61  ;;  %v2156_v45 = vsub.f32 %v4868_v33, %v5876_v38  ;;  %v4921_v61 = vand.u32 4294901760, %v288_v59  ;;  %v4934_v27 = vand.u32 4294901760, %v286_v48  ;;  %v228_v60 = vmax.f32 %v226_v41, %v227_v12  ;;  %v282_v38 = vld [vmem:[#allocation6 + $0x110] sm:$0xff] }
 0x12a   : > { %1879 = vmatmul.f32.vlgmr.msra.gmra.mxu1 %v4714_v19  ;;  %2087 = vmatpush.msrb.mxu2 %v4805_v49  ;;  %v284_v49 = vld [vmem:[#allocation6 + $0x120] sm:$0xff]  ;;  %v2179_v28 = vand.u32 4294901760, %v4919_v26  ;;  %v5883_v55 = vand.u32 4294901760, %v4698_v20 }
 0x12b   : > { %2046 = vmatpush.msrb.mxu1 %v4584_v43  ;;  %2134 = vmatpush.msrb.mxu3 %v2133_v11  ;;  %v5878_v43 = vand.u32 4294901760, %v4882_v9  ;;  %v4950_v41 = vand.u32 4294901760, %v284_v49 }
 0x12c   : > { %1999 = vmatpush.msrb.mxu0 %v5877_v4  ;;  %2089 = vmatpush.msrb.mxu2 %v4810_v25 }
 0x12d   : > { %2048 = vmatpush.msrb.mxu1 %v4591_v17  ;;  %2140 = vmatpush.msrb.mxu3 %v2139_v46  ;;  %v2162_v11 = vsub.f32 %v4882_v9, %v5878_v43  ;;  %v2157_v17 = vand.u32 4294901760, %v2156_v45  ;;  %v5880_v46 = vand.u32 4294901760, %v4895_v2  ;;  %v4945_v43 = vsub.f32 %v288_v59, %v4921_v61 }
 0x12e   : > { %2003 = vmatpush.msrb.mxu0 %v5879_v3  ;;  %2091 = vmatpush.msrb.mxu2 %v4824_v58  ;;  %v2185_v45 = vand.u32 4294901760, %v4932_v16  ;;  %v4958_v59 = vsub.f32 %v286_v48, %v4934_v27  ;;  %v280_v3 = vld [vmem:[#allocation6 + $0x100] sm:$0xff]  ;;  %v4976_v20 = vsub.f32 %v284_v49, %v4950_v41 }
 0x12f   : > { %2050 = vmatpush.msrb.mxu1 %v4598_v29  ;;  %2146 = vmatpush.msrb.mxu3 %v2145_v63  ;;  %v2168_v4 = vsub.f32 %v4895_v2, %v5880_v46  ;;  %v2163_v29 = vand.u32 4294901760, %v2162_v11  ;;  %v5882_v63 = vand.u32 4294901760, %v4907_v5  ;;  %v4963_v46 = vand.u32 4294901760, %v282_v38 }
 0x130   : > { %2007 = vmatpush.msrb.mxu0 %v5881_v56  ;;  %2093 = vmatpush.msrb.mxu2 %v4841_v30  ;;  %v2180_v11 = vsub.f32 %v4919_v26, %v2179_v28  ;;  %v2191_v48 = vand.u32 4294901760, %v4945_v43  ;;  %v5884_v56 = vand.u32 4294901760, %v4703_v22  ;;  %v5885_v22 = vand.u32 4294901760, %v4724_v10 }
 0x131   : > { %2052 = vmatpush.msrb.mxu1 %v4608_v35  ;;  %2152 = vmatpush.msrb.mxu3 %v2151_v18  ;;  %v2174_v12 = vsub.f32 %v4907_v5, %v5882_v63  ;;  %v4965_v35 = vand.u32 4294901760, %v228_v60  ;;  %v2169_v18 = vand.u32 4294901760, %v2168_v4  ;;  %v4978_v63 = vand.u32 4294901760, %v280_v3 }
 0x132   : > { %2011 = vmatpush.msrb.mxu0 %v5883_v55  ;;  %2095 = vmatpush.msrb.mxu2 %v4857_v0  ;;  %v2197_v4 = vand.u32 4294901760, %v4958_v59  ;;  %v4989_v49 = vsub.f32 %v282_v38, %v4963_v46  ;;  %v2203_v10 = vand.u32 4294901760, %v4976_v20 }
 0x133   : > { %2054 = vmatpush.msrb.mxu1 %v4615_v54  ;;  %2158 = vmatpush.msrb.mxu3 %v2157_v17  ;;  %v2175_v54 = vand.u32 4294901760, %v2174_v12  ;;  %v2186_v17 = vsub.f32 %v4932_v16, %v2185_v45  ;;  %v4992_v55 = vsub.f32 %v228_v60, %v4965_v35  ;;  %v5887_v12 = vand.u32 4294901760, %v4736_v53 }
 0x134   : > { %2015 = vmatpush.msrb.mxu0 %v5884_v56  ;;  %2097 = vmatpush.msrb.mxu2 %v4870_v32  ;;  %v5003_v38 = vsub.f32 %v280_v3, %v4978_v63  ;;  %v2198_v60 = vsub.f32 %v4958_v59, %v2197_v4  ;;  %v2209_v53 = vand.u32 4294901760, %v4989_v49  ;;  %v5890_v3 = vand.u32 4294901760, %v4761_v6 }
 0x135   : > { %2056 = vmatpush.msrb.mxu1 %v4629_v52  ;;  %2164 = vmatpush.msrb.mxu3 %v2163_v29  ;;  %5886 = vst [vmem:[#allocation16_spill] sm:$0xff] %v4992_v55  ;;  %v2181_v52 = vand.u32 4294901760, %v2180_v11  ;;  %v2192_v29 = vsub.f32 %v4945_v43, %v2191_v48  ;;  %v5014_v11 = vand.u32 4294901760, %v4992_v55 }
 0x136   : > { %2019 = vmatpush.msrb.mxu0 %v5885_v22  ;;  %2099 = vmatpush.msrb.mxu2 %v4884_v24  ;;  %v2215_v56 = vand.u32 4294901760, %v5003_v38  ;;  %v5892_v22 = vand.u32 4294901760, %v4803_v37 }
 0x137   : > { %2058 = vmatpush.msrb.mxu1 %v4646_v40  ;;  %2170 = vmatpush.msrb.mxu3 %v2169_v18  ;;  %v2187_v40 = vand.u32 4294901760, %v2186_v17  ;;  %v5888_v18 = vand.u32 4294901760, %v4749_v13  ;;  %5889 = vst [vmem:[#allocation14_spill] sm:$0xff] %v5014_v11  ;;  %v2204_v13 = vsub.f32 %v4976_v20, %v2203_v10  ;;  %v5891_v17 = vand.u32 4294901760, %v4780_v34 }
 0x138   : > { %2023 = vmatpush.msrb.mxu0 %v5887_v12  ;;  %2101 = vmatpush.msrb.mxu2 %v4897_v1  ;;  %v2117_v6 = vsub.f32 %v4992_v55, %v5014_v11  ;;  %v2216_v34 = vsub.f32 %v5003_v38, %v2215_v56  ;;  %v263_v12 = vld [vmem:[#allocation6 + $0x78] sm:$0xff] }
 0x139   : > { %2060 = vmatpush.msrb.mxu1 %v4656_v14  ;;  %2176 = vmatpush.msrb.mxu3 %v2175_v54  ;;  %v2193_v14 = vand.u32 4294901760, %v2192_v29  ;;  %v2199_v54 = vand.u32 4294901760, %v2198_v60  ;;  %v5894_v29 = vld [vmem:[#allocation17_spill] sm:$0xff] }
 0x13a   : > { %2027 = vmatpush.msrb.mxu0 %v5888_v18  ;;  %2103 = vmatpush.msrb.mxu2 %v4909_v44  ;;  %v2217_v37 = vand.u32 4294901760, %v2216_v34  ;;  %v261_v60 = vld [vmem:[#allocation6 + $0x68] sm:$0xff] }
 0x13b   : > { %2062 = vmatpush.msrb.mxu1 %v4670_v7  ;;  %2182 = vmatpush.msrb.mxu3 %v2181_v52  ;;  %v2210_v7 = vsub.f32 %v4989_v49, %v2209_v53 }
 0x13c   : > { %2031 = vmatpush.msrb.mxu0 %v5890_v3  ;;  %2105 = vmatpush.msrb.mxu2 %v4921_v61 }
 0x13d   : > { %2064 = vmatpush.msrb.mxu1 %v4677_v50  ;;  %2188 = vmatpush.msrb.mxu3 %v2187_v40  ;;  %v2205_v50 = vand.u32 4294901760, %v2204_v13  ;;  %v2211_v52 = vand.u32 4294901760, %v2210_v7  ;;  %v259_v13 = vld [vmem:[#allocation6 + $0x58] sm:$0xff] }
 0x13e   : > { %2035 = vmatpush.msrb.mxu0 %v5891_v17  ;;  %2107 = vmatpush.msrb.mxu2 %v4934_v27  ;;  %v5201_v17 = vand.u32 4294901760, %v261_v60 }
 0x13f   : > { %2066 = vmatpush.msrb.mxu1 %v4694_v21  ;;  %2194 = vmatpush.msrb.mxu3 %v2193_v14  ;;  %v5043_v21 = vand.u32 4294901760, %v2117_v6  ;;  %v5188_v14 = vand.u32 4294901760, %v263_v12  ;;  %v257_v6 = vld [vmem:[#allocation6 + $0x48] sm:$0xff] }
 0x140   : > { %2039 = vmatpush.msrb.mxu0 %v5892_v22  ;;  %2109 = vmatpush.msrb.mxu2 %v4950_v41 }
 0x141   : > { %2068 = vmatpush.msrb.mxu1 %v4709_v15  ;;  %2200 = vmatpush.msrb.mxu3 %v2199_v54  ;;  %v5893_v15 = vand.u32 4294901760, %v4796_v8 }
 0x142   : > { %2041 = vmatmul.f32.vlgmr.msrb.gmra.mxu0 %v4714_v19  ;;  %2111 = vmatpush.msrb.mxu2 %v4963_v46 }
 0x143   : > { %2226 = vmatpush.msra.mxu0 %v4796_v8  ;;  %2070 = vmatpush.msrb.mxu1 %v4720_v42  ;;  %v5895_v42 = vand.u32 4294901760, %v4817_v47  ;;  %v5898_v8 = vld [vmem:[#allocation19_spill] sm:$0xff] }
 0x144   : > { %2206 = vmatpush.msrb.mxu3 %v2205_v50  ;;  %2113 = vmatpush.msrb.mxu2 %v4978_v63  ;;  %v5212_v50 = vand.u32 4294901760, %v259_v13 }
 0x145   : > { %2229 = vmatpush.msra.mxu0 %v4817_v47  ;;  %2072 = vmatpush.msrb.mxu1 %v4733_v57  ;;  %v5896_v57 = vand.u32 4294901760, %v4829_v51  ;;  %v5897_v47 = vand.u32 4294901760, %v4837_v23 }
 0x146   : > { %2212 = vmatpush.msrb.mxu3 %v2211_v52  ;;  %2119 = vmatmul.f32.vlgmr.msrb.gmra.mxu2 %v5043_v21  ;;  %v5216_v52 = vsub.f32 %v263_v12, %v5188_v14 }
 0x147   : > { %2232 = vmatpush.msra.mxu0 %v4829_v51  ;;  %2320 = vmatpush.msra.mxu2 %v5893_v15  ;;  %v255_v15 = vld [vmem:[#allocation6 + $0x38] sm:$0xff] }
 0x148   : > { %2074 = vmatpush.msrb.mxu1 %v5894_v29  ;;  %2218 = vmatpush.msrb.mxu3 %v2217_v37 }
 0x149   : > { %2220 = vmatmul.f32.vlgmr.msrb.gmra.mxu3 %v4965_v35  ;;  %2235 = vmatpush.msra.mxu0 %v4837_v23  ;;  %v5901_v23 = vand.u32 4294901760, %v4882_v9 }
 0x14a   : > { %2324 = vmatpush.msra.mxu2 %v5895_v42  ;;  %2387 = vmatpush.msra.mxu3 %v4768_v62  ;;  %v5224_v42 = vand.u32 4294901760, %v257_v6 }
 0x14b   : > { %2076 = vmatpush.msrb.mxu1 %v4774_v36  ;;  %2238 = vmatpush.msra.mxu0 %v4849_v31  ;;  %v5899_v36 = vand.u32 4294901760, %v4849_v31  ;;  %v273_v31 = vld [vmem:[#allocation6 + $0xc8] sm:$0xff] }
 0x14c   : > { %2078 = vmatmul.f32.vlgmr.msrb.gmra.mxu1 %v4714_v19  ;;  %2328 = vmatpush.msra.mxu2 %v5896_v57 }
 0x14d   : > { %2279 = vmatpush.msra.mxu1 %v4768_v62  ;;  %2389 = vmatpush.msra.mxu3 %v4787_v39  ;;  %v5900_v62 = vand.u32 4294901760, %v4868_v33 }
 0x14e   : > { %2241 = vmatpush.msra.mxu0 %v4868_v33  ;;  %2332 = vmatpush.msra.mxu2 %v5897_v47  ;;  %v5903_v33 = vand.u32 4294901760, %v4907_v5  ;;  %v5228_v47 = vsub.f32 %v261_v60, %v5201_v17 }
 0x14f   : > { %2281 = vmatpush.msra.mxu1 %v4787_v39  ;;  %2391 = vmatpush.msra.mxu3 %v5898_v8  ;;  %v5902_v39 = vand.u32 4294901760, %v4895_v2 }
 0x150   : > { %2244 = vmatpush.msra.mxu0 %v4882_v9  ;;  %2336 = vmatpush.msra.mxu2 %v5899_v36  ;;  %v5126_v9 = vand.u32 4294901760, %v273_v31  ;;  %v253_v36 = vld [vmem:[#allocation6 + $0x28] sm:$0xff] }
 0x151   : > { %2283 = vmatpush.msra.mxu1 %v5898_v8  ;;  %2393 = vmatpush.msra.mxu3 %v4810_v25 }
 0x152   : > { %2247 = vmatpush.msra.mxu0 %v4895_v2  ;;  %2340 = vmatpush.msra.mxu2 %v5900_v62  ;;  %v275_v2 = vld [vmem:[#allocation6 + $0xd8] sm:$0xff] }
 0x153   : > { %2285 = vmatpush.msra.mxu1 %v4810_v25  ;;  %2395 = vmatpush.msra.mxu3 %v4824_v58  ;;  %v279_v25 = vld [vmem:[#allocation6 + $0xf8] sm:$0xff] }
 0x154   : > { %2250 = vmatpush.msra.mxu0 %v4907_v5  ;;  %2344 = vmatpush.msra.mxu2 %v5901_v23  ;;  %v269_v5 = vld [vmem:[#allocation6 + $0xa8] sm:$0xff]  ;;  %v5236_v23 = vand.u32 4294901760, %v255_v15 }
 0x155   : > { %2287 = vmatpush.msra.mxu1 %v4824_v58  ;;  %2397 = vmatpush.msra.mxu3 %v4841_v30  ;;  %v277_v58 = vld [vmem:[#allocation6 + $0xe8] sm:$0xff] }
 0x156   : > { %2253 = vmatpush.msra.mxu0 %v4919_v26  ;;  %2348 = vmatpush.msra.mxu2 %v5902_v39  ;;  %v5109_v51 = vand.u32 4294901760, %v277_v58  ;;  %v5753_v39 = vand.u32 4294901760, %v5216_v52  ;;  %v5262_v12 = vsub.f32 %v255_v15, %v5236_v23 }
 0x157   : > { %2289 = vmatpush.msra.mxu1 %v4841_v30  ;;  %2399 = vmatpush.msra.mxu3 %v4857_v0  ;;  %v5102_v30 = vand.u32 4294901760, %v279_v25 }
 0x158   : > { %2256 = vmatpush.msra.mxu0 %v4932_v16  ;;  %2352 = vmatpush.msra.mxu2 %v5903_v33  ;;  %v5240_v33 = vsub.f32 %v259_v13, %v5212_v50 }
 0x159   : > { %2291 = vmatpush.msra.mxu1 %v4857_v0  ;;  %2401 = vmatpush.msra.mxu3 %v4870_v32  ;;  %v5119_v0 = vsub.f32 %v279_v25, %v5102_v30 }
 0x15a   : > { %2259 = vmatpush.msra.mxu0 %v4945_v43  ;;  %2356 = vmatpush.msra.mxu2 %v2179_v28  ;;  %v5145_v28 = vand.u32 4294901760, %v269_v5  ;;  %v267_v43 = vld [vmem:[#allocation6 + $0x98] sm:$0xff] }
 0x15b   : > { %2293 = vmatpush.msra.mxu1 %v4870_v32  ;;  %2403 = vmatpush.msra.mxu3 %v4884_v24  ;;  %v5116_v32 = vand.u32 4294901760, %v275_v2 }
 0x15c   : > { %2262 = vmatpush.msra.mxu0 %v4958_v59  ;;  %2360 = vmatpush.msra.mxu2 %v2185_v45  ;;  %v5151_v45 = vsub.f32 %v273_v31, %v5126_v9  ;;  %v5751_v31 = vand.u32 4294901760, %v5228_v47 }
 0x15d   : > { %2295 = vmatpush.msra.mxu1 %v4884_v24  ;;  %2405 = vmatpush.msra.mxu3 %v4897_v1  ;;  %v271_v24 = vld [vmem:[#allocation6 + $0xb8] sm:$0xff]  ;;  %v5140_v16 = vsub.f32 %v275_v2, %v5116_v32  ;;  %v5248_v2 = vand.u32 4294901760, %v253_v36 }
 0x15e   : > { %2265 = vmatpush.msra.mxu0 %v4976_v20  ;;  %2364 = vmatpush.msra.mxu2 %v2191_v48  ;;  %v5134_v26 = vand.u32 4294901760, %v271_v24  ;;  %v265_v48 = vld [vmem:[#allocation6 + $0x88] sm:$0xff]  ;;  %v5164_v20 = vand.u32 4294901760, %v267_v43  ;;  %v2521_v13 = vsub.f32 %v5228_v47, %v5751_v31  ;;  %v303_v31 = vld [vmem:[#allocation6 + $0x1b8] sm:$0xff] }
 0x15f   : > { %2297 = vmatpush.msra.mxu1 %v4897_v1  ;;  %2407 = vmatpush.msra.mxu3 %v4909_v44  ;;  %v5129_v1 = vsub.f32 %v277_v58, %v5109_v51 }
 0x160   : > { %2268 = vmatpush.msra.mxu0 %v4989_v49  ;;  %2368 = vmatpush.msra.mxu2 %v2197_v4  ;;  %v5157_v59 = vsub.f32 %v271_v24, %v5134_v26  ;;  %v5761_v4 = vand.u32 4294901760, %v5140_v16  ;;  %v5170_v49 = vsub.f32 %v269_v5, %v5145_v28  ;;  %v5191_v3 = vsub.f32 %v267_v43, %v5164_v20  ;;  %v251_v5 = vld [vmem:[#allocation6 + $0x18] sm:$0xff] }
 0x161   : > { %2299 = vmatpush.msra.mxu1 %v4909_v44  ;;  %2409 = vmatpush.msra.mxu3 %v4921_v61  ;;  %v2466_v44 = vand.u32 4294901760, %v5119_v0  ;;  %v5252_v24 = vsub.f32 %v257_v6, %v5224_v42  ;;  %v5266_v60 = vand.u32 4294901760, %v251_v5  ;;  %v309_v6 = vld [vmem:[#allocation6 + $0x1e8] sm:$0xff] }
 0x162   : > { %2271 = vmatpush.msra.mxu0 %v5003_v38  ;;  %2372 = vmatpush.msra.mxu2 %v2203_v10  ;;  %v5177_v10 = vand.u32 4294901760, %v265_v48  ;;  %v5759_v38 = vand.u32 4294901760, %v5151_v45  ;;  %v5758_v40 = vand.u32 4294901760, %v5157_v59  ;;  %v5755_v34 = vand.u32 4294901760, %v5191_v3 }
 0x163   : > { %2301 = vmatpush.msra.mxu1 %v4921_v61  ;;  %2411 = vmatpush.msra.mxu3 %v4934_v27  ;;  %v2472_v61 = vand.u32 4294901760, %v5129_v1 }
 0x164   : > { %2274 = vmatmul.f32.vlgmr.msra.gmra.mxu0 %v4992_v55  ;;  %2376 = vmatpush.msra.mxu2 %v2209_v53  ;;  %v2479_v53 = vsub.f32 %v5140_v16, %v5761_v4  ;;  %v2485_v54 = vsub.f32 %v5151_v45, %v5759_v38  ;;  %v5204_v7 = vsub.f32 %v265_v48, %v5177_v10  ;;  %v5906_v38 = vld [vmem:[#allocation18_spill] sm:$0xff]  ;;  %v297_v4 = vld [vmem:[#allocation6 + $0x188] sm:$0xff] }
 0x165   : > { %2424 = vmatpush.msrb.mxu0 %v5102_v30  ;;  %2303 = vmatpush.msra.mxu1 %v4934_v27  ;;  %v2467_v27 = vsub.f32 %v5119_v0, %v2466_v44  ;;  %v2503_v62 = vsub.f32 %v5191_v3, %v5755_v34  ;;  %v2515_v48 = vsub.f32 %v5216_v52, %v5753_v39  ;;  %v301_v34 = vld [vmem:[#allocation6 + $0x1a8] sm:$0xff] }
 0x166   : > { %2413 = vmatpush.msra.mxu3 %v4950_v41  ;;  %2380 = vmatpush.msra.mxu2 %v2215_v56  ;;  %v2480_v22 = vand.u32 4294901760, %v2479_v53  ;;  %v2486_v29 = vand.u32 4294901760, %v2485_v54  ;;  %v5754_v57 = vand.u32 4294901760, %v5204_v7  ;;  %v5274_v54 = vsub.f32 %v253_v36, %v5248_v2  ;;  %v307_v36 = vld [vmem:[#allocation6 + $0x1d8] sm:$0xff] }
 0x167   : > { %2426 = vmatpush.msrb.mxu0 %v5109_v51  ;;  %2305 = vmatpush.msra.mxu1 %v4950_v41  ;;  %v2473_v41 = vsub.f32 %v5129_v1, %v2472_v61  ;;  %v2468_v18 = vand.u32 4294901760, %v2467_v27  ;;  %v2504_v43 = vand.u32 4294901760, %v2503_v62  ;;  %v5750_v27 = vand.u32 4294901760, %v5240_v33 }
 0x168   : > { %2415 = vmatpush.msra.mxu3 %v4963_v46  ;;  %2382 = vmatmul.f32.vlgmr.msra.gmra.mxu2 %v4965_v35  ;;  %v2509_v58 = vsub.f32 %v5204_v7, %v5754_v57  ;;  %v2522_v62 = vand.u32 4294901760, %v2521_v13  ;;  %v5328_v57 = vand.u32 4294901760, %v303_v31 }
 0x169   : > { %2428 = vmatpush.msrb.mxu0 %v5116_v32  ;;  %2567 = vmatpush.msrb.mxu2 %v5119_v0  ;;  %v2474_v56 = vand.u32 4294901760, %v2473_v41  ;;  %v311_v41 = vld [vmem:[#allocation6 + $0x1f8] sm:$0xff] }
 0x16a   : > { %2307 = vmatpush.msra.mxu1 %v4963_v46  ;;  %2417 = vmatpush.msra.mxu3 %v4978_v63  ;;  %v5757_v46 = vand.u32 4294901760, %v5170_v49  ;;  %v2510_v53 = vand.u32 4294901760, %v2509_v58  ;;  %v5756_v58 = vand.u32 4294901760, %v5274_v54 }
 0x16b   : > { %2419 = vmatmul.f32.vlgmr.msra.gmra.mxu3 %v4965_v35  ;;  %2430 = vmatpush.msrb.mxu0 %v5126_v9 }
 0x16c   : > { %2570 = vmatpush.msrb.mxu2 %v5129_v1  ;;  %2620 = vmatpush.msrb.mxu3 %v5102_v30  ;;  %v2497_v37 = vsub.f32 %v5170_v49, %v5757_v46  ;;  %v5909_v1 = vand.u32 4294901760, %v5140_v16 }
 0x16d   : > { %2309 = vmatpush.msra.mxu1 %v4978_v63  ;;  %2432 = vmatpush.msrb.mxu0 %v5134_v26  ;;  %v2491_v63 = vsub.f32 %v5157_v59, %v5758_v40  ;;  %v295_v40 = vld [vmem:[#allocation6 + $0x178] sm:$0xff] }
 0x16e   : > { %2313 = vmatmul.f32.vlgmr.msra.gmra.mxu1 %v5014_v11  ;;  %2573 = vmatpush.msrb.mxu2 %v5140_v16  ;;  %v2498_v25 = vand.u32 4294901760, %v2497_v37  ;;  %v2527_v37 = vsub.f32 %v5240_v33, %v5750_v27  ;;  %v5311_v27 = vand.u32 4294901760, %v307_v36  ;;  %v293_v11 = vld [vmem:[#allocation6 + $0x168] sm:$0xff]  ;;  %v5388_v55 = vand.u32 4294901760, %v295_v40 }
 0x16f   : > { %2469 = vmatpush.msrb.mxu1 %v2468_v18  ;;  %2622 = vmatpush.msrb.mxu3 %v5109_v51  ;;  %v2492_v8 = vand.u32 4294901760, %v2491_v63  ;;  %v249_v18 = vld [vmem:[#allocation6 + $0x8] sm:$0xff]  ;;  %v5278_v63 = vand.u32 4294901760, %v311_v41 }
 0x170   : > { %2434 = vmatpush.msrb.mxu0 %v5145_v28  ;;  %2576 = vmatpush.msrb.mxu2 %v5151_v45  ;;  %v5284_v15 = vand.u32 4294901760, %v249_v18 }
 0x171   : > { %2475 = vmatpush.msrb.mxu1 %v2474_v56  ;;  %2624 = vmatpush.msrb.mxu3 %v5116_v32  ;;  %v5749_v56 = vand.u32 4294901760, %v5252_v24  ;;  %5904 = vst [vmem:[#allocation21_spill] sm:$0xff] %v5278_v63 }
 0x172   : > { %2436 = vmatpush.msrb.mxu0 %v5164_v20  ;;  %2579 = vmatpush.msrb.mxu2 %v5157_v59  ;;  %5905 = vst [vmem:[#allocation12_spill] sm:$0xff] %v5284_v15 }
 0x173   : > { %2481 = vmatpush.msrb.mxu1 %v2480_v22  ;;  %2626 = vmatpush.msrb.mxu3 %v5126_v9  ;;  %v2516_v22 = vand.u32 4294901760, %v2515_v48  ;;  %v305_v48 = vld [vmem:[#allocation6 + $0x1c8] sm:$0xff] }
 0x174   : > { %2438 = vmatpush.msrb.mxu0 %v5177_v10  ;;  %2582 = vmatpush.msrb.mxu2 %v5170_v49 }
 0x175   : > { %2487 = vmatpush.msrb.mxu1 %v2486_v29  ;;  %2628 = vmatpush.msrb.mxu3 %v5134_v26  ;;  %v5752_v29 = vand.u32 4294901760, %v5262_v12 }
 0x176   : > { %2440 = vmatpush.msrb.mxu0 %v5188_v14  ;;  %2585 = vmatpush.msrb.mxu2 %v5191_v3 }
 0x177   : > { %2493 = vmatpush.msrb.mxu1 %v2492_v8  ;;  %2630 = vmatpush.msrb.mxu3 %v5145_v28  ;;  %v5290_v8 = vsub.f32 %v251_v5, %v5266_v60  ;;  %v5302_v5 = vsub.f32 %v311_v41, %v5278_v63  ;;  %v2539_v13 = vsub.f32 %v5262_v12, %v5752_v29 }
 0x178   : > { %2442 = vmatpush.msrb.mxu0 %v5201_v17  ;;  %2588 = vmatpush.msrb.mxu2 %v5204_v7 }
 0x179   : > { %2499 = vmatpush.msrb.mxu1 %v2498_v25  ;;  %2632 = vmatpush.msrb.mxu3 %v5164_v20  ;;  %v2533_v25 = vsub.f32 %v5252_v24, %v5749_v56  ;;  %v5309_v56 = vsub.f32 %v249_v18, %v5284_v15  ;;  %v5760_v41 = vand.u32 4294901760, %v5290_v8  ;;  %v2545_v18 = vsub.f32 %v5274_v54, %v5756_v58 }
 0x17a   : > { %2444 = vmatpush.msrb.mxu0 %v5212_v50  ;;  %2591 = vmatpush.msrb.mxu2 %v5216_v52  ;;  %v5762_v39 = vand.u32 4294901760, %v5302_v5  ;;  %v5333_v58 = vsub.f32 %v307_v36, %v5311_v27  ;;  %v5345_v36 = vand.u32 4294901760, %v301_v34 }
 0x17b   : > { %2505 = vmatpush.msrb.mxu1 %v2504_v43  ;;  %2634 = vmatpush.msrb.mxu3 %v5177_v10  ;;  %v5297_v43 = vand.u32 4294901760, %v309_v6 }
 0x17c   : > { %2446 = vmatpush.msrb.mxu0 %v5224_v42  ;;  %2594 = vmatpush.msrb.mxu2 %v5228_v47 }
 0x17d   : > { %2511 = vmatpush.msrb.mxu1 %v2510_v53  ;;  %2636 = vmatpush.msrb.mxu3 %v5188_v14  ;;  %v2528_v53 = vand.u32 4294901760, %v2527_v37  ;;  %v2534_v37 = vand.u32 4294901760, %v2533_v25  ;;  %v5323_v29 = vsub.f32 %v309_v6, %v5297_v43  ;;  %v5763_v25 = vand.u32 4294901760, %v5309_v56 }
 0x17e   : > { %2448 = vmatpush.msrb.mxu0 %v5236_v23  ;;  %2597 = vmatpush.msrb.mxu2 %v5240_v33  ;;  %v2551_v6 = vsub.f32 %v5290_v8, %v5760_v41  ;;  %v2808_v41 = vsub.f32 %v5302_v5, %v5762_v39 }
 0x17f   : > { %2517 = vmatpush.msrb.mxu1 %v2516_v22  ;;  %2638 = vmatpush.msrb.mxu3 %v5201_v17  ;;  %v5316_v22 = vand.u32 4294901760, %v305_v48  ;;  %v5907_v0 = vand.u32 4294901760, %v5323_v29 }
 0x180   : > { %2450 = vmatpush.msrb.mxu0 %v5248_v2  ;;  %2600 = vmatpush.msrb.mxu2 %v5252_v24  ;;  %v2552_v39 = vand.u32 4294901760, %v2551_v6  ;;  %v2809_v6 = vand.u32 4294901760, %v2808_v41 }
 0x181   : > { %2523 = vmatpush.msrb.mxu1 %v2522_v62  ;;  %2640 = vmatpush.msrb.mxu3 %v5212_v50  ;;  %v2540_v62 = vand.u32 4294901760, %v2539_v13  ;;  %v5341_v46 = vsub.f32 %v305_v48, %v5316_v22  ;;  %v2546_v13 = vand.u32 4294901760, %v2545_v18  ;;  %v5353_v48 = vsub.f32 %v303_v31, %v5328_v57 }
 0x182   : > { %2452 = vmatpush.msrb.mxu0 %v5266_v60  ;;  %2603 = vmatpush.msrb.mxu2 %v5262_v12 }
 0x183   : > { %2529 = vmatpush.msrb.mxu1 %v2528_v53  ;;  %2642 = vmatpush.msrb.mxu3 %v5224_v42  ;;  %v299_v53 = vld [vmem:[#allocation6 + $0x198] sm:$0xff]  ;;  %v5911_v41 = vand.u32 4294901760, %v5341_v46 }
 0x184   : > { %2454 = vmatpush.msrb.mxu0 %v5284_v15  ;;  %2606 = vmatpush.msrb.mxu2 %v5274_v54  ;;  %v5361_v18 = vand.u32 4294901760, %v299_v53 }
 0x185   : > { %2535 = vmatpush.msrb.mxu1 %v2534_v37  ;;  %2644 = vmatpush.msrb.mxu3 %v5236_v23  ;;  %v2557_v37 = vsub.f32 %v5309_v56, %v5763_v25  ;;  %v5374_v25 = vand.u32 4294901760, %v297_v4  ;;  %v2826_v16 = vsub.f32 %v5341_v46, %v5911_v41 }
 0x186   : > { %2460 = vmatmul.f32.vlgmr.msrb.gmra.mxu0 %v5906_v38  ;;  %2609 = vmatpush.msrb.mxu2 %v5290_v8  ;;  %v5908_v38 = vld [vmem:[#allocation15_spill] sm:$0xff] }
 0x187   : > { %2661 = vmatpush.msra.mxu0 %v2466_v44  ;;  %2541 = vmatpush.msrb.mxu1 %v2540_v62  ;;  %v2814_v44 = vsub.f32 %v5323_v29, %v5907_v0  ;;  %v5372_v62 = vsub.f32 %v301_v34, %v5345_v36  ;;  %v5386_v0 = vsub.f32 %v299_v53, %v5361_v18 }
 0x188   : > { %2646 = vmatpush.msrb.mxu3 %v5248_v2  ;;  %2612 = vmatpush.msrb.mxu2 %v5309_v56  ;;  %v5399_v53 = vsub.f32 %v297_v4, %v5374_v25  ;;  %v5411_v4 = vsub.f32 %v295_v40, %v5388_v55 }
 0x189   : > { %2665 = vmatpush.msra.mxu0 %v2472_v61  ;;  %2547 = vmatpush.msrb.mxu1 %v2546_v13  ;;  %v2558_v61 = vand.u32 4294901760, %v2557_v37  ;;  %v5910_v13 = vand.u32 4294901760, %v5333_v58  ;;  %v5913_v37 = vand.u32 4294901760, %v5151_v45  ;;  %v2815_v31 = vand.u32 4294901760, %v2814_v44 }
 0x18a   : > { %2648 = vmatpush.msrb.mxu3 %v5266_v60  ;;  %2615 = vmatmul.f32.vlgmr.msrb.gmra.mxu2 %v5908_v38  ;;  %v291_v38 = vld [vmem:[#allocation6 + $0x158] sm:$0xff]  ;;  %v5915_v45 = vand.u32 4294901760, %v5157_v59  ;;  %v5916_v59 = vand.u32 4294901760, %v5372_v62 }
 0x18b   : > { %2669 = vmatpush.msra.mxu0 %v5909_v1  ;;  %2765 = vmatpush.msra.mxu2 %v5278_v63  ;;  %v2820_v34 = vsub.f32 %v5333_v58, %v5910_v13  ;;  %v5912_v1 = vld [vmem:[#allocation20_spill] sm:$0xff]  ;;  %v5401_v63 = vand.u32 4294901760, %v293_v11  ;;  %v287_v13 = vld [vmem:[#allocation6 + $0x138] sm:$0xff] }
 0x18c   : > { %2553 = vmatpush.msrb.mxu1 %v2552_v39  ;;  %2650 = vmatpush.msrb.mxu3 %v5284_v15  ;;  %v5914_v39 = vand.u32 4294901760, %v5353_v48  ;;  %v289_v15 = vld [vmem:[#allocation6 + $0x148] sm:$0xff] }
 0x18d   : > { %2654 = vmatmul.f32.vlgmr.msrb.gmra.mxu3 %v5912_v1  ;;  %2673 = vmatpush.msra.mxu0 %v5913_v37  ;;  %v2821_v44 = vand.u32 4294901760, %v2820_v34  ;;  %v5769_v1 = vand.u32 4294901760, %v5386_v0  ;;  %v5413_v37 = vand.u32 4294901760, %v291_v38  ;;  %v5423_v40 = vsub.f32 %v293_v11, %v5401_v63  ;;  %v285_v34 = vld [vmem:[#allocation6 + $0x128] sm:$0xff] }
 0x18e   : > { %2767 = vmatpush.msra.mxu2 %v5297_v43  ;;  %2810 = vmatpush.msra.mxu3 %v2809_v6  ;;  %v2832_v41 = vsub.f32 %v5353_v48, %v5914_v39  ;;  %v2827_v6 = vand.u32 4294901760, %v2826_v16  ;;  %v5425_v39 = vand.u32 4294901760, %v289_v15 }
 0x18f   : > { %2559 = vmatpush.msrb.mxu1 %v2558_v61  ;;  %2677 = vmatpush.msra.mxu0 %v5915_v45  ;;  %v2838_v61 = vsub.f32 %v5372_v62, %v5916_v59  ;;  %v5917_v45 = vand.u32 4294901760, %v5170_v49  ;;  %v5436_v11 = vsub.f32 %v291_v38, %v5413_v37  ;;  %v5438_v59 = vand.u32 4294901760, %v287_v13 }
 0x190   : > { %2561 = vmatmul.f32.vlgmr.msrb.gmra.mxu1 %v4714_v19  ;;  %2769 = vmatpush.msra.mxu2 %v5311_v27  ;;  %v2833_v16 = vand.u32 4294901760, %v2832_v41  ;;  %v5918_v49 = vand.u32 4294901760, %v5191_v3  ;;  %v5919_v41 = vand.u32 4294901760, %v5399_v53  ;;  %v5449_v38 = vsub.f32 %v289_v15, %v5425_v39 }
 0x191   : > { %2728 = vmatpush.msra.mxu1 %v5102_v30  ;;  %2816 = vmatpush.msra.mxu3 %v2815_v31  ;;  %v2844_v30 = vsub.f32 %v5386_v0, %v5769_v1  ;;  %v283_v1 = vld [vmem:[#allocation6 + $0x118] sm:$0xff]  ;;  %v5920_v31 = vand.u32 4294901760, %v5204_v7  ;;  %v5454_v3 = vand.u32 4294901760, %v285_v34  ;;  %v5462_v15 = vsub.f32 %v287_v13, %v5438_v59 }
 0x192   : > { %2681 = vmatpush.msra.mxu0 %v5917_v45  ;;  %2771 = vmatpush.msra.mxu2 %v5316_v22  ;;  %v2861_v45 = vand.u32 4294901760, %v5423_v40  ;;  %v5922_v7 = vand.u32 4294901760, %v5216_v52  ;;  %v5923_v13 = vand.u32 4294901760, %v5228_v47  ;;  %v5924_v47 = vand.u32 4294901760, %v5240_v33 }
 0x193   : > { %2730 = vmatpush.msra.mxu1 %v5109_v51  ;;  %2822 = vmatpush.msra.mxu3 %v2821_v44  ;;  %v2839_v51 = vand.u32 4294901760, %v2838_v61  ;;  %v2850_v44 = vsub.f32 %v5399_v53, %v5919_v41  ;;  %v281_v41 = vld [vmem:[#allocation6 + $0x108] sm:$0xff]  ;;  %v5478_v52 = vsub.f32 %v285_v34, %v5454_v3 }
 0x194   : > { %2685 = vmatpush.msra.mxu0 %v5918_v49  ;;  %2773 = vmatpush.msra.mxu2 %v5328_v57  ;;  %v2867_v49 = vand.u32 4294901760, %v5436_v11 }
 0x195   : > { %2732 = vmatpush.msra.mxu1 %v5116_v32  ;;  %2828 = vmatpush.msra.mxu3 %v2827_v6  ;;  %v2845_v32 = vand.u32 4294901760, %v2844_v30  ;;  %v5921_v6 = vand.u32 4294901760, %v5411_v4  ;;  %v2873_v30 = vand.u32 4294901760, %v5449_v38  ;;  %v2885_v33 = vand.u32 4294901760, %v5478_v52 }
 0x196   : > { %2689 = vmatpush.msra.mxu0 %v5920_v31  ;;  %2775 = vmatpush.msra.mxu2 %v5345_v36  ;;  %v5467_v31 = vand.u32 4294901760, %v283_v1 }
 0x197   : > { %2734 = vmatpush.msra.mxu1 %v5126_v9  ;;  %2834 = vmatpush.msra.mxu3 %v2833_v16  ;;  %v2856_v61 = vsub.f32 %v5411_v4, %v5921_v6  ;;  %v2851_v9 = vand.u32 4294901760, %v2850_v44  ;;  %v2862_v16 = vsub.f32 %v5423_v40, %v2861_v45  ;;  %v5480_v6 = vand.u32 4294901760, %v281_v41 }
 0x198   : > { %2693 = vmatpush.msra.mxu0 %v5922_v7  ;;  %2777 = vmatpush.msra.mxu2 %v5361_v18  ;;  %v2879_v44 = vand.u32 4294901760, %v5462_v15  ;;  %v5491_v34 = vsub.f32 %v283_v1, %v5467_v31 }
 0x199   : > { %2736 = vmatpush.msra.mxu1 %v5134_v26  ;;  %2840 = vmatpush.msra.mxu3 %v2839_v51  ;;  %v2857_v26 = vand.u32 4294901760, %v2856_v61  ;;  %v2868_v51 = vsub.f32 %v5436_v11, %v2867_v49  ;;  %v5925_v61 = vand.u32 4294901760, %v5252_v24  ;;  %v5502_v7 = vsub.f32 %v281_v41, %v5480_v6 }
 0x19a   : > { %2697 = vmatpush.msra.mxu0 %v5923_v13  ;;  %2779 = vmatpush.msra.mxu2 %v5374_v25  ;;  %v2880_v1 = vsub.f32 %v5462_v15, %v2879_v44  ;;  %v2891_v24 = vand.u32 4294901760, %v5491_v34 }
 0x19b   : > { %2738 = vmatpush.msra.mxu1 %v5145_v28  ;;  %2846 = vmatpush.msra.mxu3 %v2845_v32  ;;  %v2863_v28 = vand.u32 4294901760, %v2862_v16  ;;  %v2874_v32 = vsub.f32 %v5449_v38, %v2873_v30  ;;  %v5927_v16 = vand.u32 4294901760, %v5274_v54  ;;  %v5929_v54 = vand.u32 4294901760, %v5309_v56  ;;  %v5932_v56 = vld [vmem:[#allocation21_spill] sm:$0xff] }
 0x19c   : > { %2701 = vmatpush.msra.mxu0 %v5924_v47  ;;  %2781 = vmatpush.msra.mxu2 %v5388_v55  ;;  %v2881_v13 = vand.u32 4294901760, %v2880_v1 }
 0x19d   : > { %2740 = vmatpush.msra.mxu1 %v5164_v20  ;;  %2852 = vmatpush.msra.mxu3 %v2851_v9  ;;  %v2869_v20 = vand.u32 4294901760, %v2868_v51  ;;  %v5926_v9 = vand.u32 4294901760, %v5262_v12  ;;  %v2875_v41 = vand.u32 4294901760, %v2874_v32  ;;  %v2897_v12 = vand.u32 4294901760, %v5502_v7 }
 0x19e   : > { %2705 = vmatpush.msra.mxu0 %v5925_v61  ;;  %2783 = vmatpush.msra.mxu2 %v5401_v63 }
 0x19f   : > { %2742 = vmatpush.msra.mxu1 %v5177_v10  ;;  %2858 = vmatpush.msra.mxu3 %v2857_v26  ;;  %v2886_v10 = vsub.f32 %v5478_v52, %v2885_v33  ;;  %v5928_v26 = vand.u32 4294901760, %v5290_v8  ;;  %v2898_v8 = vsub.f32 %v5502_v7, %v2897_v12 }
 0x1a0   : > { %2709 = vmatpush.msra.mxu0 %v5926_v9  ;;  %2785 = vmatpush.msra.mxu2 %v5413_v37 }
 0x1a1   : > { %2744 = vmatpush.msra.mxu1 %v5188_v14  ;;  %2864 = vmatpush.msra.mxu3 %v2863_v28  ;;  %v2892_v14 = vsub.f32 %v5491_v34, %v2891_v24 }
 0x1a2   : > { %2713 = vmatpush.msra.mxu0 %v5927_v16  ;;  %2787 = vmatpush.msra.mxu2 %v5425_v39 }
 0x1a3   : > { %2746 = vmatpush.msra.mxu1 %v5201_v17  ;;  %2870 = vmatpush.msra.mxu3 %v2869_v20  ;;  %v2887_v17 = vand.u32 4294901760, %v2886_v10  ;;  %v2893_v51 = vand.u32 4294901760, %v2892_v14 }
 0x1a4   : > { %2717 = vmatpush.msra.mxu0 %v5928_v26  ;;  %2789 = vmatpush.msra.mxu2 %v5438_v59 }
 0x1a5   : > { %2748 = vmatpush.msra.mxu1 %v5212_v50  ;;  %2876 = vmatpush.msra.mxu3 %v2875_v41  ;;  %v2899_v50 = vand.u32 4294901760, %v2898_v8 }
 0x1a6   : > { %2721 = vmatpush.msra.mxu0 %v5929_v54  ;;  %2791 = vmatpush.msra.mxu2 %v5454_v3 }
 0x1a7   : > { %2750 = vmatpush.msra.mxu1 %v5224_v42  ;;  %2882 = vmatpush.msra.mxu3 %v2881_v13  ;;  %v5930_v42 = vand.u32 4294901760, %v5302_v5 }
 0x1a8   : > { %2723 = vmatmul.f32.vlgmr.msra.gmra.mxu0 %v4714_v19  ;;  %2793 = vmatpush.msra.mxu2 %v5467_v31 }
 0x1a9   : > { %2908 = vmatpush.msrb.mxu0 %v5302_v5  ;;  %2752 = vmatpush.msra.mxu1 %v5236_v23  ;;  %v5931_v23 = vand.u32 4294901760, %v5323_v29  ;;  %v570_v5 = vpop.f32.mrf.mxu2 }
 0x1aa   : > { %2888 = vmatpush.msra.mxu3 %v2887_v17  ;;  %2795 = vmatpush.msra.mxu2 %v5480_v6 }
 0x1ab   : > { %2911 = vmatpush.msrb.mxu0 %v5323_v29  ;;  %2754 = vmatpush.msra.mxu1 %v5248_v2  ;;  %v5933_v2 = vld [vmem:[#allocation12_spill] sm:$0xff]  ;;  %v5937_v29 = vand.u32 4294901760, %v5372_v62 }
 0x1ac   : > { %2894 = vmatpush.msra.mxu3 %v2893_v51  ;;  %2801 = vmatmul.f32.vlgmr.msra.gmra.mxu2 %v5043_v21  ;;  %v5934_v21 = vand.u32 4294901760, %v5333_v58 }
 0x1ad   : > { %2914 = vmatpush.msrb.mxu0 %v5333_v58  ;;  %3002 = vmatpush.msrb.mxu2 %v5930_v42  ;;  %v5940_v58 = vand.u32 4294901760, %v5411_v4 }
 0x1ae   : > { %2756 = vmatpush.msra.mxu1 %v5266_v60  ;;  %2900 = vmatpush.msra.mxu3 %v2899_v50  ;;  %v5935_v60 = vand.u32 4294901760, %v5341_v46 }
 0x1af   : > { %2902 = vmatmul.f32.vlgmr.msra.gmra.mxu3 %v4965_v35  ;;  %2917 = vmatpush.msrb.mxu0 %v5341_v46  ;;  %v5938_v46 = vand.u32 4294901760, %v5386_v0 }
 0x1b0   : > { %3006 = vmatpush.msrb.mxu2 %v5931_v23  ;;  %3069 = vmatpush.msrb.mxu3 %v5932_v56 }
 0x1b1   : > { %2758 = vmatpush.msra.mxu1 %v5933_v2  ;;  %2920 = vmatpush.msrb.mxu0 %v5353_v48 }
 0x1b2   : > { %2760 = vmatmul.f32.vlgmr.msra.gmra.mxu1 %v4714_v19  ;;  %3010 = vmatpush.msrb.mxu2 %v5934_v21  ;;  %v5936_v19 = vand.u32 4294901760, %v5353_v48  ;;  %v756_v48 = vpop.f32.mrf.mxu2 }
 0x1b3   : > { %2961 = vmatpush.msrb.mxu1 %v5932_v56  ;;  %3071 = vmatpush.msrb.mxu3 %v5297_v43 }
 0x1b4   : > { %2923 = vmatpush.msrb.mxu0 %v5372_v62  ;;  %3014 = vmatpush.msrb.mxu2 %v5935_v60 }
 0x1b5   : > { %2963 = vmatpush.msrb.mxu1 %v5297_v43  ;;  %3073 = vmatpush.msrb.mxu3 %v5311_v27  ;;  %v516_v43 = vpop.f32.mrf.mxu1 }
 0x1b6   : > { %2926 = vmatpush.msrb.mxu0 %v5386_v0  ;;  %3018 = vmatpush.msrb.mxu2 %v5936_v19 }
 0x1b7   : > { %2965 = vmatpush.msrb.mxu1 %v5311_v27  ;;  %3075 = vmatpush.msrb.mxu3 %v5316_v22  ;;  %v5939_v27 = vand.u32 4294901760, %v5399_v53 }
 0x1b8   : > { %2929 = vmatpush.msrb.mxu0 %v5399_v53  ;;  %3022 = vmatpush.msrb.mxu2 %v5937_v29 }
 0x1b9   : > { %2967 = vmatpush.msrb.mxu1 %v5316_v22  ;;  %3077 = vmatpush.msrb.mxu3 %v5328_v57  ;;  %v609_v22 = vpop.f32.mrf.mxu3 }
 0x1ba   : > { %2932 = vmatpush.msrb.mxu0 %v5411_v4  ;;  %3026 = vmatpush.msrb.mxu2 %v5938_v46 }
 0x1bb   : > { %2969 = vmatpush.msrb.mxu1 %v5328_v57  ;;  %3079 = vmatpush.msrb.mxu3 %v5345_v36  ;;  %v5942_v57 = vld [vmem:[#allocation14_spill] sm:$0xff] }
 0x1bc   : > { %2935 = vmatpush.msrb.mxu0 %v5423_v40  ;;  %3030 = vmatpush.msrb.mxu2 %v5939_v27 }
 0x1bd   : > { %2971 = vmatpush.msrb.mxu1 %v5345_v36  ;;  %3081 = vmatpush.msrb.mxu3 %v5361_v18  ;;  %v715_v36 = vpop.f32.mrf.mxu1 }
 0x1be   : > { %2938 = vmatpush.msrb.mxu0 %v5436_v11  ;;  %3034 = vmatpush.msrb.mxu2 %v5940_v58 }
 0x1bf   : > { %2973 = vmatpush.msrb.mxu1 %v5361_v18  ;;  %3083 = vmatpush.msrb.mxu3 %v5374_v25 }
 0x1c0   : > { %2941 = vmatpush.msrb.mxu0 %v5449_v38  ;;  %3038 = vmatpush.msrb.mxu2 %v2861_v45 }
 0x1c1   : > { %2975 = vmatpush.msrb.mxu1 %v5374_v25  ;;  %3085 = vmatpush.msrb.mxu3 %v5388_v55  ;;  %v857_v0 = vpop.f32.mrf.mxu3 }
 0x1c2   : > { %2944 = vmatpush.msrb.mxu0 %v5462_v15  ;;  %3042 = vmatpush.msrb.mxu2 %v2867_v49 }
 0x1c3   : > { %2977 = vmatpush.msrb.mxu1 %v5388_v55  ;;  %3087 = vmatpush.msrb.mxu3 %v5401_v63  ;;  %v5941_v55 = vld [vmem:[#allocation16_spill] sm:$0xff] }
 0x1c4   : > { %2947 = vmatpush.msrb.mxu0 %v5478_v52  ;;  %3046 = vmatpush.msrb.mxu2 %v2873_v30 }
 0x1c5   : > { %2979 = vmatpush.msrb.mxu1 %v5401_v63  ;;  %3089 = vmatpush.msrb.mxu3 %v5413_v37  ;;  %v415_v63 = vpop.f32.mrf.mxu0  ;;  %v950_v53 = vpop.f32.mrf.mxu1 }
 0x1c6   : > { %2950 = vmatpush.msrb.mxu0 %v5491_v34  ;;  %3050 = vmatpush.msrb.mxu2 %v2879_v44  ;;  %v517_v18 = vadd.f32 %v516_v43, %v415_v63 }
 0x1c7   : > { %2981 = vmatpush.msrb.mxu1 %v5413_v37  ;;  %3091 = vmatpush.msrb.mxu3 %v5425_v39  ;;  %v1019_v37 = vpop.f32.mrf.mxu2 }
 0x1c8   : > { %2953 = vmatpush.msrb.mxu0 %v5502_v7  ;;  %3054 = vmatpush.msrb.mxu2 %v2885_v33  ;;  %v571_v4 = vadd.f32 %v570_v5, %v517_v18 }
 0x1c9   : > { %2983 = vmatpush.msrb.mxu1 %v5425_v39  ;;  %3093 = vmatpush.msrb.mxu3 %v5438_v59 }
 0x1ca   : > { %2956 = vmatmul.f32.vlgmr.msrb.gmra.mxu0 %v5941_v55  ;;  %3058 = vmatpush.msrb.mxu2 %v2891_v24  ;;  %v610_v40 = vadd.f32 %v609_v22, %v571_v4 }
 0x1cb   : > { %2985 = vmatpush.msrb.mxu1 %v5438_v59  ;;  %3095 = vmatpush.msrb.mxu3 %v5454_v3 }
 0x1cc   : > { %3062 = vmatpush.msrb.mxu2 %v2897_v12 }
 0x1cd   : > { %2987 = vmatpush.msrb.mxu1 %v5454_v3  ;;  %3097 = vmatpush.msrb.mxu3 %v5467_v31  ;;  %v678_v25 = vpop.f32.mrf.mxu0  ;;  %v1198_v11 = vpop.f32.mrf.mxu1 }
 0x1ce   : > { %3064 = vmatmul.f32.vlgmr.msrb.gmra.mxu2 %v4965_v35  ;;  %v679_v59 = vadd.f32 %v678_v25, %v610_v40 }
 0x1cf   : > { %2989 = vmatpush.msrb.mxu1 %v5467_v31  ;;  %3099 = vmatpush.msrb.mxu3 %v5480_v6  ;;  %v1252_v45 = vpop.f32.mrf.mxu2 }
 0x1d0   : > { %3101 = vmatmul.f32.vlgmr.msrb.gmra.mxu3 %v4965_v35  ;;  %v1056_v35 = vpop.f32.mrf.mxu3  ;;  %v716_v38 = vadd.f32 %v715_v36, %v679_v59 }
 0x1d1   : > { %2991 = vmatpush.msrb.mxu1 %v5480_v6 }
 0x1d2   : > { %2995 = vmatmul.f32.vlgmr.msrb.gmra.mxu1 %v5942_v57  ;;  %v757_v15 = vadd.f32 %v756_v48, %v716_v38 }
 0x1d4   : > { %v858_v30 = vadd.f32 %v857_v0, %v757_v15 }
 0x1d5   : > { %v911_v62 = vpop.f32.mrf.mxu0  ;;  %v1397_v31 = vpop.f32.mrf.mxu1 }
 0x1d6   : > { %v912_v44 = vadd.f32 %v911_v62, %v858_v30 }
 0x1d7   : > { %v1438_v6 = vpop.f32.mrf.mxu2 }
 0x1d8   : > { %v1291_v3 = vpop.f32.mrf.mxu3  ;;  %v951_v34 = vadd.f32 %v950_v53, %v912_v44 }
 0x1da   : > { %v1020_v33 = vadd.f32 %v1019_v37, %v951_v34 }
 0x1dc   : > { %v1057_v9 = vadd.f32 %v1056_v35, %v1020_v33  ;;  %v3106_v35 = vstv %s3105_s21 }
 0x1dd   : > { %v1097_v39 = vpop.f32.mrf.mxu0  ;;  %v1632_v61 = vpop.f32.mrf.mxu1 }
 0x1de   : > { %v1199_v52 = vadd.f32 %v1198_v11, %v1097_v39 }
 0x1df   : > { %v1701_v20 = vpop.f32.mrf.mxu2 }
 0x1e0   : > { %v1253_v28 = vadd.f32 %v1252_v45, %v1199_v52  ;;  %v1539_v32 = vpop.f32.mrf.mxu3 }
 0x1e2   : > { %v1292_v7 = vadd.f32 %v1291_v3, %v1253_v28 }
 0x1e5   : > { %v1360_v49 = vpop.f32.mrf.mxu0  ;;  %v1880_v16 = vpop.f32.mrf.mxu1 }
 0x1e6   : > { %v1361_v24 = vadd.f32 %v1360_v49, %v1292_v7 }
 0x1e7   : > { %v1934_v26 = vpop.f32.mrf.mxu2 }
 0x1e8   : > { %v1738_v41 = vpop.f32.mrf.mxu3  ;;  %v1398_v12 = vadd.f32 %v1397_v31, %v1361_v24 }
 0x1ea   : > { %v1439_v54 = vadd.f32 %v1438_v6, %v1398_v12 }
 0x1ec   : > { %v1540_v50 = vadd.f32 %v1539_v32, %v1439_v54 }
 0x1ed   : > { %v1593_v47 = vpop.f32.mrf.mxu0  ;;  %v2079_v51 = vpop.f32.mrf.mxu1 }
 0x1ee   : > { %v1594_v56 = vadd.f32 %v1593_v47, %v1540_v50 }
 0x1ef   : > { %v2120_v23 = vpop.f32.mrf.mxu2 }
 0x1f0   : > { %v1973_v8 = vpop.f32.mrf.mxu3  ;;  %v1633_v60 = vadd.f32 %v1632_v61, %v1594_v56 }
 0x1f2   : > { %v1702_v27 = vadd.f32 %v1701_v20, %v1633_v60 }
 0x1f4   : > { %v1739_v63 = vadd.f32 %v1738_v41, %v1702_v27 }
 0x1f5   : > { %v1779_v1 = vpop.f32.mrf.mxu0  ;;  %v2314_v46 = vpop.f32.mrf.mxu1 }
 0x1f6   : > { %v1780_v10 = vadd.f32 %v1779_v1, %v1057_v9 }
 0x1f7   : > { %v2383_v55 = vpop.f32.mrf.mxu2 }
 0x1f8   : > { %v1881_v13 = vadd.f32 %v1880_v16, %v1780_v10  ;;  %v2221_v29 = vpop.f32.mrf.mxu3 }
 0x1fa   : > { %v1935_v17 = vadd.f32 %v1934_v26, %v1881_v13 }
 0x1fc   : > { %v1974_v42 = vadd.f32 %v1973_v8, %v1935_v17 }
 0x1fd   : > { %v2042_v14 = vpop.f32.mrf.mxu0 }
 0x1fe   : > { %v2043_v2 = vadd.f32 %v2042_v14, %v1974_v42 }
 0x200   : > { %v2080_v19 = vadd.f32 %v2079_v51, %v2043_v2  ;;  %v2420_v5 = vpop.f32.mrf.mxu3  ;;  %v3153_v2 = vlaneseq }
 0x202   : > { %v2121_v58 = vadd.f32 %v2120_v23, %v2080_v19  ;;  %vm3155_vm10 = vcmp.lt.s32.totalorder %v3153_v2, 256 }
 0x204   : > { %v2222_v43 = vadd.f32 %v2221_v29, %v2121_v58 }
 0x205   : > { %v2275_v21 = vpop.f32.mrf.mxu0 }
 0x206   : > { %v2276_v25 = vadd.f32 %v2275_v21, %v2222_v43 }
 0x208   : > { %v2315_v48 = vadd.f32 %v2314_v46, %v2276_v25 }
 0x20a   : > { %v2384_v0 = vadd.f32 %v2383_v55, %v2315_v48 }
 0x20c   : > { %v2421_v40 = vadd.f32 %v2420_v5, %v2384_v0 }
 0x20d   : > { %v2461_v57 = vpop.f32.mrf.mxu0  ;;  %v2562_v22 = vpop.f32.mrf.mxu1 }
 0x20e   : > { %v2462_v36 = vadd.f32 %v2461_v57, %v1739_v63  ;;  %v2616_v62 = vpop.f32.mrf.mxu2  ;;  %v3107_v45 = vadd.f32 %v3106_v35, %v2421_v40 }
 0x210   : > { %v2563_v18 = vadd.f32 %v2562_v22, %v2462_v36  ;;  %v2655_v4 = vpop.f32.mrf.mxu3  ;;  %v3265_v49 = vmul.f32 -1.442695, %v3107_v45 }
 0x212   : > { %v2617_v53 = vadd.f32 %v2616_v62, %v2563_v18  ;;  %3331 = vpow2.f32 %v3265_v49 }
 0x214   : > { %v2656_v39 = vadd.f32 %v2655_v4, %v2617_v53 }
 0x218   : > { %v3332_v28 = vpop.eup %3331 }
 0x219   : > { %v3115_v7 = vadd.f32 1.0, %v3332_v28 }
 0x21b   : > { %3333 = vrcp.f32 %v3115_v7  ;;  %vm3122_vm3 = vweird.f32 %v3115_v7  ;;  %v3128_v50 = vand.u32 2147483648, %v3115_v7  ;;  %v3126_v23 = vand.u32 2147483647, %v3115_v7 }
 0x21d   : > { %v3129_v29 = vor.u32 1.1754944e-38, %v3128_v50  ;;  %vm3127_vm9 = vcmp.eq.f32.partialorder %v3126_v23, 8.507059e+37 }
 0x221   : > { %v3334_v9 = vpop.eup %3333 }
 0x222   : > { %v3118_v16 = vmul.f32 %v3334_v9, %v3115_v7  ;;  %vm3123_vm1 = vweird.f32 %v3334_v9 }
 0x223   : > { %vm5634_vm5 = vmor %vm3122_vm3, %vm3123_vm1 }
 0x224   : > { %v3119_v10 = vsub.f32 1.0, %v3118_v16 }
 0x225   : > { %v2724_v37 = vpop.f32.mrf.mxu0 }
 0x226   : > { %v2725_v59 = vadd.f32 %v2724_v37, %v2656_v39  ;;  %v3120_v13 = vmul.f32 %v3334_v9, %v3119_v10 }
 0x228   : > { %v3121_v8 = vadd.f32 %v3334_v9, %v3120_v13 }
 0x22a   : > { %v3125_v60 = vsel %vm5634_vm5, %v3334_v9, %v3121_v8 }
 0x22b   : > { %v3130_v58 = vsel %vm3127_vm9, %v3129_v29, %v3125_v60 }
 0x22f   : > { %v2761_v11 = vpop.f32.mrf.mxu1  ;;  %v2802_v3 = vpop.f32.mrf.mxu2 }
 0x230   : > { %v2762_v38 = vadd.f32 %v2761_v11, %v2725_v59 }
 0x232   : > { %v2803_v15 = vadd.f32 %v2802_v3, %v2762_v38  ;;  %v2903_v31 = vpop.f32.mrf.mxu3 }
 0x234   : > { %v2904_v52 = vadd.f32 %v2903_v31, %v2803_v15 }
 0x247   : > { %v2957_v30 = vpop.f32.mrf.mxu0 }
 0x248   : > { %v2958_v6 = vadd.f32 %v2957_v30, %v2904_v52 }
 0x24f   : > { %v2996_v44 = vpop.f32.mrf.mxu1 }
 0x250   : > { %v2997_v47 = vadd.f32 %v2996_v44, %v2958_v6 }
 0x251   : > { %v3065_v34 = vpop.f32.mrf.mxu2 }
 0x252   : > { %v3066_v32 = vadd.f32 %v3065_v34, %v2997_v47 }
 0x253   : > { %v3102_v61 = vpop.f32.mrf.mxu3 }
 0x254   : > { %v3103_v33 = vadd.f32 %v3102_v61, %v3066_v32 }
 0x256   : > { %v3108_v20 = vadd.f32 %v3106_v35, %v3103_v33 }
 0x258   : > { %v3266_v1 = vmul.f32 -1.442695, %v3108_v20 }
 0x25a   : > { %3335 = vpow2.f32 %v3266_v1 }
 0x260   : > { %v3336_v24 = vpop.eup %3335 }
 0x261   : > { %v3116_v41 = vadd.f32 1.0, %v3336_v24 }
 0x263   : > { %3337 = vrcp.f32 %v3116_v41  ;;  %v3143_v54 = vand.u32 2147483648, %v3116_v41  ;;  %v3141_v51 = vand.u32 2147483647, %v3116_v41  ;;  %vm3137_vm4 = vweird.f32 %v3116_v41 }
 0x265   : > { %v3144_v21 = vor.u32 1.1754944e-38, %v3143_v54  ;;  %vm3142_vm7 = vcmp.eq.f32.partialorder %v3141_v51, 8.507059e+37 }
 0x269   : > { %v3338_v12 = vpop.eup %3337 }
 0x26a   : > { %v3133_v26 = vmul.f32 %v3338_v12, %v3116_v41  ;;  %vm3138_vm2 = vweird.f32 %v3338_v12 }
 0x26b   : > { %vm3139_vm6 = vmor %vm3137_vm4, %vm3138_vm2 }
 0x26c   : > { %v3134_v14 = vsub.f32 1.0, %v3133_v26 }
 0x26e   : > { %v3135_v17 = vmul.f32 %v3338_v12, %v3134_v14 }
 0x270   : > { %v3136_v56 = vadd.f32 %v3338_v12, %v3135_v17 }
 0x272   : > { %v3140_v19 = vsel %vm3139_vm6, %v3338_v12, %v3136_v56 }
 0x273   : > { %v3145_v46 = vsel %vm3142_vm7, %v3144_v21, %v3140_v19 }
 0x274   : > { %v3149_v27 = vrot.slane %v3145_v46, 7 }
 0x276   : > { %v3151_v55 = vsel %vm3150_vm8, %v3130_v58, %v3149_v27 }
 0x277   : > { %3157 = vst.msk [vmem:[%s206_s20] sm:$0x3] %vm3155_vm10, %v3151_v55 }
 0x278   : > { %3426 = shalt.err (!%p3423_p9)
}
 0x279   : > { %3278 = dma.vmem_to_hbm [thread:$0]  (%p3557_p13), %s3172_s19, 32, %s3174_s22, %s3159_s23  }
 0x27a PF: > { %s3185_s6 = sand.u32 1, %s3457_s14   ;;  %p5945_p10 = scmp.ge.s32.totalorder %s3469_s17, 2 }
 0x27b   : > { %s3186_s10 = scalar_lea.sflag [#allocation5], %s3185_s6 }
 0x27c   : > { %p3289_p11 = pnand %p5945_p10, %p3562_p4 }
 0x27e   : > { %p3290_p0 = pneg %p3289_p11 }
 0x280   : > { %3452 = dma.done.wait (%p3290_p0), %s3186_s10, 32  }
 0x281   : > { %3454 = vsyncadd (%p3290_p0), %s3186_s10, 4294967264  ;;  %p18_p2 = scmp.ge.s32.totalorder %s3537_s27, 4   ;;  %s5946_s14 = smov %s3461_s15 }
 0x282   : > { %s5947_s15 = smov %s3465_s16  ;;  %s5948_s16 = smov %s3549_s30 }
 0x283   : > { %s5949_s17 = smov %s3537_s27  ;;  %20 = sbr.rel (!%p18_p2) target bundleno = 8 (0x8), region = 82 }
 0x288   :  { %3192 = vsyncpa [#allocation4], 1 }
 0x289   :  { %3194 = vsyncpa [#allocation4 + $0x1], 1 }
 0x28a   :  { %3195 = vsyncpa [#allocation7], 1 }
 0x28b   :  { %3196 = vsyncpa [#allocation5], 1 }
 0x28c   :  { %3198 = vsyncpa [#allocation5 + $0x1], 1 }

</bundles_post_ra>
